<compile_context>
chip_gen: v7x
topology: tpu7x:2x2x1
jax: 0.10.0
libtpu: 0.0.40
codegen_flags: <defaults>
</compile_context>

<pallas_src>
import math
import functools

import jax
import jax.numpy as jnp
from jax.experimental import pallas as pl
from jax.experimental.pallas import tpu as pltpu


_PARALLEL_B = pltpu.CompilerParams(dimension_semantics=("parallel",))


# ---------------------------------------------------------------------------
# In-kernel helpers (traced inside the Pallas kernels)
# ---------------------------------------------------------------------------

def _softmax_rows(s):
    """Row softmax with EUP approx reciprocal for the denominator."""
    s = s - jnp.max(s, axis=-1, keepdims=True)
    e = jnp.exp(s)
    return e * pl.reciprocal(jnp.sum(e, axis=-1, keepdims=True), approx=True)


def _layer_norm(z, gamma, beta, eps):
    """LayerNorm over the channel (last) axis; gamma/beta are (1, C)."""
    mu = jnp.mean(z, axis=-1, keepdims=True)
    var = jnp.mean(jnp.square(z - mu), axis=-1, keepdims=True)
    return (z - mu) * jax.lax.rsqrt(var + eps) * gamma + beta


def _mha_core(q, k, v, bias, wo, bo, n_heads, scale):
    """All heads + fused output projection.  q:(Tt,C)  k,v:(Ts,C)  bias:(Tt,Ts).

    The per-head output is folded straight into its slice of the output
    projection, so the head concat never materializes and the accumulator
    stays lane-dense at (Tt, C)."""
    Tt, C = q.shape
    Dh = C // n_heads
    acc = jnp.zeros((Tt, C), jnp.float32)
    for hh in range(n_heads):
        lo, hi = hh * Dh, (hh + 1) * Dh
        qh = q[:, lo:hi] * scale                              # (Tt, Dh)
        kh = k[:, lo:hi]                                      # (Ts, Dh)
        vh = v[:, lo:hi]                                      # (Ts, Dh)
        s = jnp.dot(qh, kh.T, preferred_element_type=jnp.float32)   # (Tt, Ts)
        p = _softmax_rows(s + bias)
        oh = jnp.dot(p, vh, preferred_element_type=jnp.float32)     # (Tt, Dh)
        acc = acc + jnp.dot(oh, wo[lo:hi, :],
                            preferred_element_type=jnp.float32)
    return acc + bo


# ---------------------------------------------------------------------------
# Fused per-layer kernels
# ---------------------------------------------------------------------------

def _self_block_kernel(x_ref, bias_ref, wqkv_ref, bqkv_ref, wo_ref, bo_ref,
                       g_ref, b_ref, o_ref, *, n_heads, eps):
    """Self-attention + output proj + residual + LayerNorm for one batch elem."""
    x = x_ref[0].astype(jnp.float32)                          # (Tt, C)
    C = x.shape[1]
    qkv = jnp.dot(x, wqkv_ref[...],
                  preferred_element_type=jnp.float32) + bqkv_ref[...]  # (Tt,3C)
    scale = 1.0 / math.sqrt(C // n_heads)
    y = _mha_core(qkv[:, :C], qkv[:, C:2 * C], qkv[:, 2 * C:],
                  bias_ref[...], wo_ref[...], bo_ref[...], n_heads, scale)
    o_ref[0] = _layer_norm(x + y, g_ref[...], b_ref[...], eps).astype(o_ref.dtype)


def _encdec_block_kernel(x_ref, h_ref, bias_ref, wq_ref, bq_ref, wkv_ref,
                         bkv_ref, wo_ref, bo_ref, g_ref, b_ref, o_ref, *,
                         n_heads, eps):
    """Enc-dec attention + output proj + residual + LayerNorm for one batch."""
    x = x_ref[0].astype(jnp.float32)                          # (Tt, C)
    hm = h_ref[0].astype(jnp.float32)                         # (Ts, C)
    C = x.shape[1]
    q = jnp.dot(x, wq_ref[...],
                preferred_element_type=jnp.float32) + bq_ref[...]     # (Tt, C)
    kv = jnp.dot(hm, wkv_ref[...],
                 preferred_element_type=jnp.float32) + bkv_ref[...]   # (Ts, 2C)
    scale = 1.0 / math.sqrt(C // n_heads)
    y = _mha_core(q, kv[:, :C], kv[:, C:], bias_ref[0],
                  wo_ref[...], bo_ref[...], n_heads, scale)
    o_ref[0] = _layer_norm(x + y, g_ref[...], b_ref[...], eps).astype(o_ref.dtype)


def _ffn_block_kernel(x_ref, m_ref, w1_ref, b1_ref, w2_ref, b2_ref,
                      g_ref, b_ref, o_ref, *, K, eps):
    """Causal FFN (mask->conv1->relu->mask->conv2->mask) + residual + LN."""
    x = x_ref[0].astype(jnp.float32)                          # (Tt, C)
    xm = m_ref[0].astype(jnp.float32)                         # (Tt, 1)
    Tt = x.shape[0]

    # Causal shift-by-s expressed as a constant sub-diagonal matmul:
    # (S_s @ a)[t] = a[t - s] (zero-filled for t < s).  Avoids unaligned
    # sublane slices / relayouts; the tiny shift matmuls ride the MXU.
    def shift_mat(s):
        r = jax.lax.broadcasted_iota(jnp.int32, (Tt, Tt), 0)
        c = jax.lax.broadcasted_iota(jnp.int32, (Tt, Tt), 1)
        return (r - c == s).astype(jnp.float32)

    shifts = [None] + [shift_mat(s) for s in range(1, K)]

    def causal_conv(a, w, b_):
        # a: (Tt, Cin) already masked; w: (K, Cin, Cout) loaded taps.
        acc = jnp.dot(a, w[K - 1], preferred_element_type=jnp.float32)
        for j in range(K - 1):
            s = K - 1 - j
            a_s = jnp.dot(shifts[s], a, preferred_element_type=jnp.float32)
            acc = acc + jnp.dot(a_s, w[j], preferred_element_type=jnp.float32)
        return acc + b_

    h1 = jnp.maximum(causal_conv(x * xm, w1_ref[...], b1_ref[...]), 0.0)
    y = causal_conv(h1 * xm, w2_ref[...], b2_ref[...]) * xm
    o_ref[0] = _layer_norm(x + y, g_ref[...], b_ref[...], eps).astype(o_ref.dtype)


# ---------------------------------------------------------------------------
# pallas_call wrappers (grid over batch, "parallel" for v7x megacore)
# ---------------------------------------------------------------------------

def self_attn_block(x, bias, p, gamma, beta, n_heads, eps=1e-5):
    B, Tt, C = x.shape
    kern = functools.partial(_self_block_kernel, n_heads=n_heads, eps=eps)
    return pl.pallas_call(
        kern,
        out_shape=jax.ShapeDtypeStruct((B, Tt, C), x.dtype),
        grid=(B,),
        in_specs=[
            pl.BlockSpec((1, Tt, C), lambda b: (b, 0, 0)),
            pl.BlockSpec((Tt, Tt), lambda b: (0, 0)),
            pl.BlockSpec((C, 3 * C), lambda b: (0, 0)),
            pl.BlockSpec((1, 3 * C), lambda b: (0, 0)),
            pl.BlockSpec((C, C), lambda b: (0, 0)),
            pl.BlockSpec((1, C), lambda b: (0, 0)),
            pl.BlockSpec((1, C), lambda b: (0, 0)),
            pl.BlockSpec((1, C), lambda b: (0, 0)),
        ],
        out_specs=pl.BlockSpec((1, Tt, C), lambda b: (b, 0, 0)),
        compiler_params=_PARALLEL_B,
    )(x, bias, p["wqkv"], p["bqkv"], p["wo"], p["bo"], gamma, beta)


def encdec_attn_block(x, h, bias, p, gamma, beta, n_heads, eps=1e-5):
    B, Tt, C = x.shape
    Ts = h.shape[1]
    kern = functools.partial(_encdec_block_kernel, n_heads=n_heads, eps=eps)
    return pl.pallas_call(
        kern,
        out_shape=jax.ShapeDtypeStruct((B, Tt, C), x.dtype),
        grid=(B,),
        in_specs=[
            pl.BlockSpec((1, Tt, C), lambda b: (b, 0, 0)),
            pl.BlockSpec((1, Ts, C), lambda b: (b, 0, 0)),
            pl.BlockSpec((1, Tt, Ts), lambda b: (b, 0, 0)),
            pl.BlockSpec((C, C), lambda b: (0, 0)),
            pl.BlockSpec((1, C), lambda b: (0, 0)),
            pl.BlockSpec((C, 2 * C), lambda b: (0, 0)),
            pl.BlockSpec((1, 2 * C), lambda b: (0, 0)),
            pl.BlockSpec((C, C), lambda b: (0, 0)),
            pl.BlockSpec((1, C), lambda b: (0, 0)),
            pl.BlockSpec((1, C), lambda b: (0, 0)),
            pl.BlockSpec((1, C), lambda b: (0, 0)),
        ],
        out_specs=pl.BlockSpec((1, Tt, C), lambda b: (b, 0, 0)),
        compiler_params=_PARALLEL_B,
    )(x, h, bias, p["wq"], p["bq"], p["wkv"], p["bkv"], p["wo"], p["bo"],
      gamma, beta)


def ffn_block(x, x_mask, p, gamma, beta, kernel_size, eps=1e-5):
    B, Tt, C = x.shape
    K = kernel_size
    F = p["w1"].shape[2]
    kern = functools.partial(_ffn_block_kernel, K=K, eps=eps)
    return pl.pallas_call(
        kern,
        out_shape=jax.ShapeDtypeStruct((B, Tt, C), x.dtype),
        grid=(B,),
        in_specs=[
            pl.BlockSpec((1, Tt, C), lambda b: (b, 0, 0)),
            pl.BlockSpec((1, Tt, 1), lambda b: (b, 0, 0)),
            pl.BlockSpec((K, C, F), lambda b: (0, 0, 0)),
            pl.BlockSpec((1, F), lambda b: (0, 0)),
            pl.BlockSpec((K, F, C), lambda b: (0, 0, 0)),
            pl.BlockSpec((1, C), lambda b: (0, 0)),
            pl.BlockSpec((1, C), lambda b: (0, 0)),
            pl.BlockSpec((1, C), lambda b: (0, 0)),
        ],
        out_specs=pl.BlockSpec((1, Tt, C), lambda b: (b, 0, 0)),
        compiler_params=_PARALLEL_B,
    )(x, x_mask, p["w1"], p["b1"], p["w2"], p["b2"], gamma, beta)


# ---------------------------------------------------------------------------
# Module-level composition (boundary transposes / masks in plain JAX)
# ---------------------------------------------------------------------------

def decoder_forward(params, x, x_mask, h, h_mask, *, n_heads, n_layers,
                    kernel_size):
    """x: (B,C,Tt)  x_mask: (B,1,Tt)  h: (B,C,Ts)  h_mask: (B,1,Ts) -> (B,C,Tt)."""
    B, C, Tt = x.shape
    Ts = h.shape[2]
    xt = jnp.transpose(x, (0, 2, 1)).astype(jnp.float32)      # (B, Tt, C)
    ht = jnp.transpose(h, (0, 2, 1)).astype(jnp.float32)      # (B, Ts, C)
    xm = jnp.transpose(x_mask, (0, 2, 1)).astype(jnp.float32)  # (B, Tt, 1)
    hm = jnp.transpose(h_mask, (0, 2, 1)).astype(jnp.float32)  # (B, Ts, 1)

    # Precomputed additive mask biases: 0 where attended, -1e4 where masked.
    tril = jnp.tril(jnp.ones((Tt, Tt), jnp.float32))           # subsequent_mask
    self_bias = (tril - 1.0) * 1e4                             # (Tt, Tt)
    encdec_mask = xm * jnp.transpose(hm, (0, 2, 1))            # (B, Tt, Ts)
    encdec_bias = (encdec_mask - 1.0) * 1e4

    xt = xt * xm
    for i in range(n_layers):
        lp = params["layers"][i]
        xt = self_attn_block(xt, self_bias, lp["self_attn"],
                             lp["ln0_g"], lp["ln0_b"], n_heads)
        xt = encdec_attn_block(xt, ht, encdec_bias, lp["encdec_attn"],
                               lp["ln1_g"], lp["ln1_b"], n_heads)
        xt = ffn_block(xt, xm, lp["ffn"], lp["ln2_g"], lp["ln2_b"], kernel_size)
    xt = xt * xm
    return jnp.transpose(xt, (0, 2, 1))


# ---------------------------------------------------------------------------
# Deterministic parameter init (synthetic, mirrors module __init__ shapes,
# with QKV / KV weights pre-concatenated for the fused kernels)
# ---------------------------------------------------------------------------

def init_params(key, hidden, filter_ch, n_heads, n_layers, kernel_size):
    def xavier(k, cin, cout):
        lim = math.sqrt(6.0 / (cin + cout))
        return jax.random.uniform(k, (cin, cout), jnp.float32, -lim, lim)

    def bias(k, fan_in, cout):
        lim = 1.0 / math.sqrt(fan_in)
        return jax.random.uniform(k, (1, cout), jnp.float32, -lim, lim)

    def conv_taps(k, cin, cout, K):
        lim = 1.0 / math.sqrt(cin * K)
        return jax.random.uniform(k, (K, cin, cout), jnp.float32, -lim, lim)

    layer_keys = jax.random.split(key, n_layers)
    layers = []
    for i in range(n_layers):
        ks = jax.random.split(layer_keys[i], 20)
        # self-attention (proximal_init=True -> conv_k copies conv_q)
        wq, bq = xavier(ks[0], hidden, hidden), bias(ks[1], hidden, hidden)
        wv, bv = xavier(ks[2], hidden, hidden), bias(ks[3], hidden, hidden)
        self_attn = dict(
            wqkv=jnp.concatenate([wq, wq, wv], axis=1),        # wk == wq
            bqkv=jnp.concatenate([bq, bq, bv], axis=1),
            wo=xavier(ks[4], hidden, hidden), bo=bias(ks[5], hidden, hidden))
        wk2, bk2 = xavier(ks[8], hidden, hidden), bias(ks[9], hidden, hidden)
        wv2, bv2 = xavier(ks[10], hidden, hidden), bias(ks[11], hidden, hidden)
        encdec_attn = dict(
            wq=xavier(ks[6], hidden, hidden), bq=bias(ks[7], hidden, hidden),
            wkv=jnp.concatenate([wk2, wv2], axis=1),
            bkv=jnp.concatenate([bk2, bv2], axis=1),
            wo=xavier(ks[12], hidden, hidden), bo=bias(ks[13], hidden, hidden))
        ffn = dict(
            w1=conv_taps(ks[14], hidden, filter_ch, kernel_size),
            b1=bias(ks[15], hidden * kernel_size, filter_ch),
            w2=conv_taps(ks[16], filter_ch, hidden, kernel_size),
            b2=bias(ks[17], filter_ch * kernel_size, hidden))
        layers.append(dict(
            self_attn=self_attn, encdec_attn=encdec_attn, ffn=ffn,
            ln0_g=jnp.ones((1, hidden), jnp.float32),
            ln0_b=jnp.zeros((1, hidden), jnp.float32),
            ln1_g=jnp.ones((1, hidden), jnp.float32),
            ln1_b=jnp.zeros((1, hidden), jnp.float32),
            ln2_g=jnp.ones((1, hidden), jnp.float32),
            ln2_b=jnp.zeros((1, hidden), jnp.float32)))
    return dict(layers=layers)


# ---------------------------------------------------------------------------

if __name__ == "__main__":
    B = 2
    hidden = 32
    filter_ch = 64
    n_heads = 4
    n_layers = 2
    kernel_size = 3
    Tt, Ts = 16, 12

    key = jax.random.PRNGKey(0)
    k_x, k_h, k_p = jax.random.split(key, 3)

    x = jax.random.normal(k_x, (B, hidden, Tt), jnp.float32)      # decoder input (NCT)
    h = jax.random.normal(k_h, (B, hidden, Ts), jnp.float32)      # encoder memory (NCT)

    x_lens = jnp.array([Tt, 12])
    h_lens = jnp.array([Ts, 9])
    x_mask = (jnp.arange(Tt)[None, :] < x_lens[:, None]).astype(jnp.float32)[:, None, :]
    h_mask = (jnp.arange(Ts)[None, :] < h_lens[:, None]).astype(jnp.float32)[:, None, :]

    params = init_params(k_p, hidden, filter_ch, n_heads, n_layers, kernel_size)

    fwd = jax.jit(functools.partial(decoder_forward, n_heads=n_heads,
                                    n_layers=n_layers, kernel_size=kernel_size))
    out = fwd(params, x, x_mask, h, h_mask)
    jax.block_until_ready(out)
    assert out.shape == (B, hidden, Tt)
    assert jnp.all(jnp.isfinite(out))
    print("KERNEL_OK")
</pallas_src>

<mosaic_0001>
module attributes {stable_mosaic.version = 11 : i64} {
  func.func @_self_block_kernel(%arg0: i32, %arg1: memref<1x16x32xf32, #tpu.memory_space<vmem>>, %arg2: memref<16x16xf32, #tpu.memory_space<vmem>>, %arg3: memref<32x96xf32, #tpu.memory_space<vmem>>, %arg4: memref<1x96xf32, #tpu.memory_space<vmem>>, %arg5: memref<32x32xf32, #tpu.memory_space<vmem>>, %arg6: memref<1x32xf32, #tpu.memory_space<vmem>>, %arg7: memref<1x32xf32, #tpu.memory_space<vmem>>, %arg8: memref<1x32xf32, #tpu.memory_space<vmem>>, %arg9: memref<1x16x32xf32, #tpu.memory_space<vmem>>) attributes {dimension_semantics = [#tpu.dimension_semantics<parallel>], iteration_bounds = array<i64: 2>, scalar_prefetch = 0 : i64, scratch_operands = 0 : i64, tpu.core_type = #tpu.core_type<tc>, window_params = [{transform_indices = @transform_0, window_bounds = array<i64: 1, 16, 32>}, {pipeline_mode = #tpu.pipeline_mode<synchronous>, transform_indices = @transform_1, window_bounds = array<i64: 16, 16>}, {pipeline_mode = #tpu.pipeline_mode<synchronous>, transform_indices = @transform_2, window_bounds = array<i64: 32, 96>}, {pipeline_mode = #tpu.pipeline_mode<synchronous>, transform_indices = @transform_3, window_bounds = array<i64: 1, 96>}, {pipeline_mode = #tpu.pipeline_mode<synchronous>, transform_indices = @transform_4, window_bounds = array<i64: 32, 32>}, {pipeline_mode = #tpu.pipeline_mode<synchronous>, transform_indices = @transform_5, window_bounds = array<i64: 1, 32>}, {pipeline_mode = #tpu.pipeline_mode<synchronous>, transform_indices = @transform_6, window_bounds = array<i64: 1, 32>}, {pipeline_mode = #tpu.pipeline_mode<synchronous>, transform_indices = @transform_7, window_bounds = array<i64: 1, 32>}, {transform_indices = @transform_8, window_bounds = array<i64: 1, 16, 32>}]} {
    %c0 = arith.constant 0 : index
    %c0_0 = arith.constant 0 : index
    %c0_1 = arith.constant 0 : index
    %0 = vector.load %arg1[%c0, %c0_0, %c0_1] : memref<1x16x32xf32, #tpu.memory_space<vmem>>, vector<1x16x32xf32>
    %1 = vector.shape_cast %0 : vector<1x16x32xf32> to vector<16x32xf32>
    %c0_2 = arith.constant 0 : index
    %c0_3 = arith.constant 0 : index
    %2 = vector.load %arg3[%c0_2, %c0_3] : memref<32x96xf32, #tpu.memory_space<vmem>>, vector<32x96xf32>
    %cst = arith.constant dense<0.000000e+00> : vector<16x96xf32>
    %3 = tpu.matmul %1, %2, %cst {dimension_numbers = #tpu.dot_dimension_numbers<[1], [0], [0], [1], [0, 0, 1, 1], [], []>} : vector<16x32xf32>, vector<32x96xf32>, vector<16x96xf32> -> vector<16x96xf32>
    %c0_4 = arith.constant 0 : index
    %c0_5 = arith.constant 0 : index
    %4 = vector.load %arg4[%c0_4, %c0_5] : memref<1x96xf32, #tpu.memory_space<vmem>>, vector<1x96xf32>
    %5 = vector.broadcast %4 : vector<1x96xf32> to vector<16x96xf32>
    %6 = arith.addf %3, %5 : vector<16x96xf32>
    %7 = vector.extract_strided_slice %6 {offsets = [0, 0], sizes = [16, 32], strides = [1, 1]} : vector<16x96xf32> to vector<16x32xf32>
    %8 = vector.extract_strided_slice %6 {offsets = [0, 32], sizes = [16, 32], strides = [1, 1]} : vector<16x96xf32> to vector<16x32xf32>
    %9 = vector.extract_strided_slice %6 {offsets = [0, 64], sizes = [16, 32], strides = [1, 1]} : vector<16x96xf32> to vector<16x32xf32>
    %c0_6 = arith.constant 0 : index
    %c0_7 = arith.constant 0 : index
    %10 = vector.load %arg2[%c0_6, %c0_7] : memref<16x16xf32, #tpu.memory_space<vmem>>, vector<16x16xf32>
    %c0_8 = arith.constant 0 : index
    %c0_9 = arith.constant 0 : index
    %11 = vector.load %arg5[%c0_8, %c0_9] : memref<32x32xf32, #tpu.memory_space<vmem>>, vector<32x32xf32>
    %c0_10 = arith.constant 0 : index
    %c0_11 = arith.constant 0 : index
    %12 = vector.load %arg6[%c0_10, %c0_11] : memref<1x32xf32, #tpu.memory_space<vmem>>, vector<1x32xf32>
    %cst_12 = arith.constant 0.000000e+00 : f32
    %13 = vector.broadcast %cst_12 : f32 to vector<16x32xf32>
    %14 = vector.extract_strided_slice %7 {offsets = [0, 0], sizes = [16, 8], strides = [1, 1]} : vector<16x32xf32> to vector<16x8xf32>
    %cst_13 = arith.constant 0.353553385 : f32
    %15 = vector.broadcast %cst_13 : f32 to vector<16x8xf32>
    %16 = arith.mulf %14, %15 : vector<16x8xf32>
    %17 = vector.extract_strided_slice %8 {offsets = [0, 0], sizes = [16, 8], strides = [1, 1]} : vector<16x32xf32> to vector<16x8xf32>
    %18 = vector.extract_strided_slice %9 {offsets = [0, 0], sizes = [16, 8], strides = [1, 1]} : vector<16x32xf32> to vector<16x8xf32>
    %19 = tpu.transpose %17, [1, 0] : vector<16x8xf32> -> vector<8x16xf32>
    %cst_14 = arith.constant dense<0.000000e+00> : vector<16x16xf32>
    %20 = tpu.matmul %16, %19, %cst_14 {dimension_numbers = #tpu.dot_dimension_numbers<[1], [0], [0], [1], [0, 0, 1, 1], [], []>} : vector<16x8xf32>, vector<8x16xf32>, vector<16x16xf32> -> vector<16x16xf32>
    %21 = arith.addf %20, %10 : vector<16x16xf32>
    %cst_15 = arith.constant dense<0xFF800000> : vector<16xf32>
    %22 = vector.multi_reduction <maximumf>, %21, %cst_15 [1] : vector<16x16xf32> to vector<16xf32>
    %23 = vector.shape_cast %22 : vector<16xf32> to vector<16x1xf32>
    %24 = vector.broadcast %23 : vector<16x1xf32> to vector<16x16xf32>
    %25 = arith.subf %21, %24 : vector<16x16xf32>
    %26 = math.exp %25 : vector<16x16xf32>
    %cst_16 = arith.constant dense<0.000000e+00> : vector<16xf32>
    %27 = vector.multi_reduction <add>, %26, %cst_16 [1] : vector<16x16xf32> to vector<16xf32>
    %28 = vector.shape_cast %27 : vector<16xf32> to vector<16x1xf32>
    %29 = tpu.reciprocal %28 {approx = true} : vector<16x1xf32> -> vector<16x1xf32>
    %30 = vector.broadcast %29 : vector<16x1xf32> to vector<16x16xf32>
    %31 = arith.mulf %26, %30 : vector<16x16xf32>
    %cst_17 = arith.constant dense<0.000000e+00> : vector<16x8xf32>
    %32 = tpu.matmul %31, %18, %cst_17 {dimension_numbers = #tpu.dot_dimension_numbers<[1], [0], [0], [1], [0, 0, 1, 1], [], []>} : vector<16x16xf32>, vector<16x8xf32>, vector<16x8xf32> -> vector<16x8xf32>
    %33 = vector.extract_strided_slice %11 {offsets = [0, 0], sizes = [8, 32], strides = [1, 1]} : vector<32x32xf32> to vector<8x32xf32>
    %cst_18 = arith.constant dense<0.000000e+00> : vector<16x32xf32>
    %34 = tpu.matmul %32, %33, %cst_18 {dimension_numbers = #tpu.dot_dimension_numbers<[1], [0], [0], [1], [0, 0, 1, 1], [], []>} : vector<16x8xf32>, vector<8x32xf32>, vector<16x32xf32> -> vector<16x32xf32>
    %35 = arith.addf %13, %34 : vector<16x32xf32>
    %36 = vector.extract_strided_slice %7 {offsets = [0, 8], sizes = [16, 8], strides = [1, 1]} : vector<16x32xf32> to vector<16x8xf32>
    %cst_19 = arith.constant 0.353553385 : f32
    %37 = vector.broadcast %cst_19 : f32 to vector<16x8xf32>
    %38 = arith.mulf %36, %37 : vector<16x8xf32>
    %39 = vector.extract_strided_slice %8 {offsets = [0, 8], sizes = [16, 8], strides = [1, 1]} : vector<16x32xf32> to vector<16x8xf32>
    %40 = vector.extract_strided_slice %9 {offsets = [0, 8], sizes = [16, 8], strides = [1, 1]} : vector<16x32xf32> to vector<16x8xf32>
    %41 = tpu.transpose %39, [1, 0] : vector<16x8xf32> -> vector<8x16xf32>
    %cst_20 = arith.constant dense<0.000000e+00> : vector<16x16xf32>
    %42 = tpu.matmul %38, %41, %cst_20 {dimension_numbers = #tpu.dot_dimension_numbers<[1], [0], [0], [1], [0, 0, 1, 1], [], []>} : vector<16x8xf32>, vector<8x16xf32>, vector<16x16xf32> -> vector<16x16xf32>
    %43 = arith.addf %42, %10 : vector<16x16xf32>
    %cst_21 = arith.constant dense<0xFF800000> : vector<16xf32>
    %44 = vector.multi_reduction <maximumf>, %43, %cst_21 [1] : vector<16x16xf32> to vector<16xf32>
    %45 = vector.shape_cast %44 : vector<16xf32> to vector<16x1xf32>
    %46 = vector.broadcast %45 : vector<16x1xf32> to vector<16x16xf32>
    %47 = arith.subf %43, %46 : vector<16x16xf32>
    %48 = math.exp %47 : vector<16x16xf32>
    %cst_22 = arith.constant dense<0.000000e+00> : vector<16xf32>
    %49 = vector.multi_reduction <add>, %48, %cst_22 [1] : vector<16x16xf32> to vector<16xf32>
    %50 = vector.shape_cast %49 : vector<16xf32> to vector<16x1xf32>
    %51 = tpu.reciprocal %50 {approx = true} : vector<16x1xf32> -> vector<16x1xf32>
    %52 = vector.broadcast %51 : vector<16x1xf32> to vector<16x16xf32>
    %53 = arith.mulf %48, %52 : vector<16x16xf32>
    %cst_23 = arith.constant dense<0.000000e+00> : vector<16x8xf32>
    %54 = tpu.matmul %53, %40, %cst_23 {dimension_numbers = #tpu.dot_dimension_numbers<[1], [0], [0], [1], [0, 0, 1, 1], [], []>} : vector<16x16xf32>, vector<16x8xf32>, vector<16x8xf32> -> vector<16x8xf32>
    %55 = vector.extract_strided_slice %11 {offsets = [8, 0], sizes = [8, 32], strides = [1, 1]} : vector<32x32xf32> to vector<8x32xf32>
    %cst_24 = arith.constant dense<0.000000e+00> : vector<16x32xf32>
    %56 = tpu.matmul %54, %55, %cst_24 {dimension_numbers = #tpu.dot_dimension_numbers<[1], [0], [0], [1], [0, 0, 1, 1], [], []>} : vector<16x8xf32>, vector<8x32xf32>, vector<16x32xf32> -> vector<16x32xf32>
    %57 = arith.addf %35, %56 : vector<16x32xf32>
    %58 = vector.extract_strided_slice %7 {offsets = [0, 16], sizes = [16, 8], strides = [1, 1]} : vector<16x32xf32> to vector<16x8xf32>
    %cst_25 = arith.constant 0.353553385 : f32
    %59 = vector.broadcast %cst_25 : f32 to vector<16x8xf32>
    %60 = arith.mulf %58, %59 : vector<16x8xf32>
    %61 = vector.extract_strided_slice %8 {offsets = [0, 16], sizes = [16, 8], strides = [1, 1]} : vector<16x32xf32> to vector<16x8xf32>
    %62 = vector.extract_strided_slice %9 {offsets = [0, 16], sizes = [16, 8], strides = [1, 1]} : vector<16x32xf32> to vector<16x8xf32>
    %63 = tpu.transpose %61, [1, 0] : vector<16x8xf32> -> vector<8x16xf32>
    %cst_26 = arith.constant dense<0.000000e+00> : vector<16x16xf32>
    %64 = tpu.matmul %60, %63, %cst_26 {dimension_numbers = #tpu.dot_dimension_numbers<[1], [0], [0], [1], [0, 0, 1, 1], [], []>} : vector<16x8xf32>, vector<8x16xf32>, vector<16x16xf32> -> vector<16x16xf32>
    %65 = arith.addf %64, %10 : vector<16x16xf32>
    %cst_27 = arith.constant dense<0xFF800000> : vector<16xf32>
    %66 = vector.multi_reduction <maximumf>, %65, %cst_27 [1] : vector<16x16xf32> to vector<16xf32>
    %67 = vector.shape_cast %66 : vector<16xf32> to vector<16x1xf32>
    %68 = vector.broadcast %67 : vector<16x1xf32> to vector<16x16xf32>
    %69 = arith.subf %65, %68 : vector<16x16xf32>
    %70 = math.exp %69 : vector<16x16xf32>
    %cst_28 = arith.constant dense<0.000000e+00> : vector<16xf32>
    %71 = vector.multi_reduction <add>, %70, %cst_28 [1] : vector<16x16xf32> to vector<16xf32>
    %72 = vector.shape_cast %71 : vector<16xf32> to vector<16x1xf32>
    %73 = tpu.reciprocal %72 {approx = true} : vector<16x1xf32> -> vector<16x1xf32>
    %74 = vector.broadcast %73 : vector<16x1xf32> to vector<16x16xf32>
    %75 = arith.mulf %70, %74 : vector<16x16xf32>
    %cst_29 = arith.constant dense<0.000000e+00> : vector<16x8xf32>
    %76 = tpu.matmul %75, %62, %cst_29 {dimension_numbers = #tpu.dot_dimension_numbers<[1], [0], [0], [1], [0, 0, 1, 1], [], []>} : vector<16x16xf32>, vector<16x8xf32>, vector<16x8xf32> -> vector<16x8xf32>
    %77 = vector.extract_strided_slice %11 {offsets = [16, 0], sizes = [8, 32], strides = [1, 1]} : vector<32x32xf32> to vector<8x32xf32>
    %cst_30 = arith.constant dense<0.000000e+00> : vector<16x32xf32>
    %78 = tpu.matmul %76, %77, %cst_30 {dimension_numbers = #tpu.dot_dimension_numbers<[1], [0], [0], [1], [0, 0, 1, 1], [], []>} : vector<16x8xf32>, vector<8x32xf32>, vector<16x32xf32> -> vector<16x32xf32>
    %79 = arith.addf %57, %78 : vector<16x32xf32>
    %80 = vector.extract_strided_slice %7 {offsets = [0, 24], sizes = [16, 8], strides = [1, 1]} : vector<16x32xf32> to vector<16x8xf32>
    %cst_31 = arith.constant 0.353553385 : f32
    %81 = vector.broadcast %cst_31 : f32 to vector<16x8xf32>
    %82 = arith.mulf %80, %81 : vector<16x8xf32>
    %83 = vector.extract_strided_slice %8 {offsets = [0, 24], sizes = [16, 8], strides = [1, 1]} : vector<16x32xf32> to vector<16x8xf32>
    %84 = vector.extract_strided_slice %9 {offsets = [0, 24], sizes = [16, 8], strides = [1, 1]} : vector<16x32xf32> to vector<16x8xf32>
    %85 = tpu.transpose %83, [1, 0] : vector<16x8xf32> -> vector<8x16xf32>
    %cst_32 = arith.constant dense<0.000000e+00> : vector<16x16xf32>
    %86 = tpu.matmul %82, %85, %cst_32 {dimension_numbers = #tpu.dot_dimension_numbers<[1], [0], [0], [1], [0, 0, 1, 1], [], []>} : vector<16x8xf32>, vector<8x16xf32>, vector<16x16xf32> -> vector<16x16xf32>
    %87 = arith.addf %86, %10 : vector<16x16xf32>
    %cst_33 = arith.constant dense<0xFF800000> : vector<16xf32>
    %88 = vector.multi_reduction <maximumf>, %87, %cst_33 [1] : vector<16x16xf32> to vector<16xf32>
    %89 = vector.shape_cast %88 : vector<16xf32> to vector<16x1xf32>
    %90 = vector.broadcast %89 : vector<16x1xf32> to vector<16x16xf32>
    %91 = arith.subf %87, %90 : vector<16x16xf32>
    %92 = math.exp %91 : vector<16x16xf32>
    %cst_34 = arith.constant dense<0.000000e+00> : vector<16xf32>
    %93 = vector.multi_reduction <add>, %92, %cst_34 [1] : vector<16x16xf32> to vector<16xf32>
    %94 = vector.shape_cast %93 : vector<16xf32> to vector<16x1xf32>
    %95 = tpu.reciprocal %94 {approx = true} : vector<16x1xf32> -> vector<16x1xf32>
    %96 = vector.broadcast %95 : vector<16x1xf32> to vector<16x16xf32>
    %97 = arith.mulf %92, %96 : vector<16x16xf32>
    %cst_35 = arith.constant dense<0.000000e+00> : vector<16x8xf32>
    %98 = tpu.matmul %97, %84, %cst_35 {dimension_numbers = #tpu.dot_dimension_numbers<[1], [0], [0], [1], [0, 0, 1, 1], [], []>} : vector<16x16xf32>, vector<16x8xf32>, vector<16x8xf32> -> vector<16x8xf32>
    %99 = vector.extract_strided_slice %11 {offsets = [24, 0], sizes = [8, 32], strides = [1, 1]} : vector<32x32xf32> to vector<8x32xf32>
    %cst_36 = arith.constant dense<0.000000e+00> : vector<16x32xf32>
    %100 = tpu.matmul %98, %99, %cst_36 {dimension_numbers = #tpu.dot_dimension_numbers<[1], [0], [0], [1], [0, 0, 1, 1], [], []>} : vector<16x8xf32>, vector<8x32xf32>, vector<16x32xf32> -> vector<16x32xf32>
    %101 = arith.addf %79, %100 : vector<16x32xf32>
    %102 = vector.broadcast %12 : vector<1x32xf32> to vector<16x32xf32>
    %103 = arith.addf %101, %102 : vector<16x32xf32>
    %104 = arith.addf %1, %103 : vector<16x32xf32>
    %c0_37 = arith.constant 0 : index
    %c0_38 = arith.constant 0 : index
    %105 = vector.load %arg7[%c0_37, %c0_38] : memref<1x32xf32, #tpu.memory_space<vmem>>, vector<1x32xf32>
    %c0_39 = arith.constant 0 : index
    %c0_40 = arith.constant 0 : index
    %106 = vector.load %arg8[%c0_39, %c0_40] : memref<1x32xf32, #tpu.memory_space<vmem>>, vector<1x32xf32>
    %cst_41 = arith.constant dense<0.000000e+00> : vector<16xf32>
    %107 = vector.multi_reduction <add>, %104, %cst_41 [1] : vector<16x32xf32> to vector<16xf32>
    %108 = vector.shape_cast %107 : vector<16xf32> to vector<16x1xf32>
    %cst_42 = arith.constant 3.200000e+01 : f32
    %109 = vector.broadcast %cst_42 : f32 to vector<16x1xf32>
    %110 = arith.divf %108, %109 : vector<16x1xf32>
    %111 = vector.broadcast %110 : vector<16x1xf32> to vector<16x32xf32>
    %112 = arith.subf %104, %111 : vector<16x32xf32>
    %113 = arith.mulf %112, %112 : vector<16x32xf32>
    %cst_43 = arith.constant dense<0.000000e+00> : vector<16xf32>
    %114 = vector.multi_reduction <add>, %113, %cst_43 [1] : vector<16x32xf32> to vector<16xf32>
    %115 = vector.shape_cast %114 : vector<16xf32> to vector<16x1xf32>
    %cst_44 = arith.constant 3.200000e+01 : f32
    %116 = vector.broadcast %cst_44 : f32 to vector<16x1xf32>
    %117 = arith.divf %115, %116 : vector<16x1xf32>
    %118 = vector.broadcast %110 : vector<16x1xf32> to vector<16x32xf32>
    %119 = arith.subf %104, %118 : vector<16x32xf32>
    %cst_45 = arith.constant 9.99999974E-6 : f32
    %120 = vector.broadcast %cst_45 : f32 to vector<16x1xf32>
    %121 = arith.addf %117, %120 : vector<16x1xf32>
    %122 = math.rsqrt %121 : vector<16x1xf32>
    %123 = vector.broadcast %122 : vector<16x1xf32> to vector<16x32xf32>
    %124 = arith.mulf %119, %123 : vector<16x32xf32>
    %125 = vector.broadcast %105 : vector<1x32xf32> to vector<16x32xf32>
    %126 = arith.mulf %124, %125 : vector<16x32xf32>
    %127 = vector.broadcast %106 : vector<1x32xf32> to vector<16x32xf32>
    %128 = arith.addf %126, %127 : vector<16x32xf32>
    %c0_46 = arith.constant 0 : index
    %c0_47 = arith.constant 0 : index
    %c0_48 = arith.constant 0 : index
    %129 = vector.load %arg9[%c0_46, %c0_47, %c0_48] : memref<1x16x32xf32, #tpu.memory_space<vmem>>, vector<1x16x32xf32>
    %130 = vector.shape_cast %129 : vector<1x16x32xf32> to vector<16x32xf32>
    %131 = vector.shape_cast %128 : vector<16x32xf32> to vector<1x16x32xf32>
    tpu.vector_store %arg9[%c0_46, %c0_47, %c0_48], %131 {strides = array<i32>} : memref<1x16x32xf32, #tpu.memory_space<vmem>>, vector<1x16x32xf32>,
    return
  }
  func.func @transform_0(%arg0: i32) -> (i32, i32, i32) {
    %c0_i32 = arith.constant 0 : i32
    %c0_i32_0 = arith.constant 0 : i32
    %c0_i32_1 = arith.constant 0 : i32
    return %arg0, %c0_i32, %c0_i32_0 : i32, i32, i32
  }
  func.func @transform_1(%arg0: i32) -> (i32, i32) {
    %c0_i32 = arith.constant 0 : i32
    %c0_i32_0 = arith.constant 0 : i32
    %c0_i32_1 = arith.constant 0 : i32
    return %c0_i32, %c0_i32_0 : i32, i32
  }
  func.func @transform_2(%arg0: i32) -> (i32, i32) {
    %c0_i32 = arith.constant 0 : i32
    %c0_i32_0 = arith.constant 0 : i32
    %c0_i32_1 = arith.constant 0 : i32
    return %c0_i32, %c0_i32_0 : i32, i32
  }
  func.func @transform_3(%arg0: i32) -> (i32, i32) {
    %c0_i32 = arith.constant 0 : i32
    %c0_i32_0 = arith.constant 0 : i32
    %c0_i32_1 = arith.constant 0 : i32
    return %c0_i32, %c0_i32_0 : i32, i32
  }
  func.func @transform_4(%arg0: i32) -> (i32, i32) {
    %c0_i32 = arith.constant 0 : i32
    %c0_i32_0 = arith.constant 0 : i32
    %c0_i32_1 = arith.constant 0 : i32
    return %c0_i32, %c0_i32_0 : i32, i32
  }
  func.func @transform_5(%arg0: i32) -> (i32, i32) {
    %c0_i32 = arith.constant 0 : i32
    %c0_i32_0 = arith.constant 0 : i32
    %c0_i32_1 = arith.constant 0 : i32
    return %c0_i32, %c0_i32_0 : i32, i32
  }
  func.func @transform_6(%arg0: i32) -> (i32, i32) {
    %c0_i32 = arith.constant 0 : i32
    %c0_i32_0 = arith.constant 0 : i32
    %c0_i32_1 = arith.constant 0 : i32
    return %c0_i32, %c0_i32_0 : i32, i32
  }
  func.func @transform_7(%arg0: i32) -> (i32, i32) {
    %c0_i32 = arith.constant 0 : i32
    %c0_i32_0 = arith.constant 0 : i32
    %c0_i32_1 = arith.constant 0 : i32
    return %c0_i32, %c0_i32_0 : i32, i32
  }
  func.func @transform_8(%arg0: i32) -> (i32, i32, i32) {
    %c0_i32 = arith.constant 0 : i32
    %c0_i32_0 = arith.constant 0 : i32
    %c0_i32_1 = arith.constant 0 : i32
    return %arg0, %c0_i32, %c0_i32_0 : i32, i32, i32
  }
}

module attributes {stable_mosaic.version = 11 : i64} {
  func.func @_encdec_block_kernel(%arg0: i32, %arg1: memref<1x16x32xf32, #tpu.memory_space<vmem>>, %arg2: memref<1x12x32xf32, #tpu.memory_space<vmem>>, %arg3: memref<1x16x12xf32, #tpu.memory_space<vmem>>, %arg4: memref<32x32xf32, #tpu.memory_space<vmem>>, %arg5: memref<1x32xf32, #tpu.memory_space<vmem>>, %arg6: memref<32x64xf32, #tpu.memory_space<vmem>>, %arg7: memref<1x64xf32, #tpu.memory_space<vmem>>, %arg8: memref<32x32xf32, #tpu.memory_space<vmem>>, %arg9: memref<1x32xf32, #tpu.memory_space<vmem>>, %arg10: memref<1x32xf32, #tpu.memory_space<vmem>>, %arg11: memref<1x32xf32, #tpu.memory_space<vmem>>, %arg12: memref<1x16x32xf32, #tpu.memory_space<vmem>>) attributes {dimension_semantics = [#tpu.dimension_semantics<parallel>], iteration_bounds = array<i64: 2>, scalar_prefetch = 0 : i64, scratch_operands = 0 : i64, tpu.core_type = #tpu.core_type<tc>, window_params = [{transform_indices = @transform_0, window_bounds = array<i64: 1, 16, 32>}, {transform_indices = @transform_1, window_bounds = array<i64: 1, 12, 32>}, {transform_indices = @transform_2, window_bounds = array<i64: 1, 16, 12>}, {pipeline_mode = #tpu.pipeline_mode<synchronous>, transform_indices = @transform_3, window_bounds = array<i64: 32, 32>}, {pipeline_mode = #tpu.pipeline_mode<synchronous>, transform_indices = @transform_4, window_bounds = array<i64: 1, 32>}, {pipeline_mode = #tpu.pipeline_mode<synchronous>, transform_indices = @transform_5, window_bounds = array<i64: 32, 64>}, {pipeline_mode = #tpu.pipeline_mode<synchronous>, transform_indices = @transform_6, window_bounds = array<i64: 1, 64>}, {pipeline_mode = #tpu.pipeline_mode<synchronous>, transform_indices = @transform_7, window_bounds = array<i64: 32, 32>}, {pipeline_mode = #tpu.pipeline_mode<synchronous>, transform_indices = @transform_8, window_bounds = array<i64: 1, 32>}, {pipeline_mode = #tpu.pipeline_mode<synchronous>, transform_indices = @transform_9, window_bounds = array<i64: 1, 32>}, {pipeline_mode = #tpu.pipeline_mode<synchronous>, transform_indices = @transform_10, window_bounds = array<i64: 1, 32>}, {transform_indices = @transform_11, window_bounds = array<i64: 1, 16, 32>}]} {
    %c0 = arith.constant 0 : index
    %c0_0 = arith.constant 0 : index
    %c0_1 = arith.constant 0 : index
    %0 = vector.load %arg1[%c0, %c0_0, %c0_1] : memref<1x16x32xf32, #tpu.memory_space<vmem>>, vector<1x16x32xf32>
    %1 = vector.shape_cast %0 : vector<1x16x32xf32> to vector<16x32xf32>
    %c0_2 = arith.constant 0 : index
    %c0_3 = arith.constant 0 : index
    %c0_4 = arith.constant 0 : index
    %2 = vector.load %arg2[%c0_2, %c0_3, %c0_4] : memref<1x12x32xf32, #tpu.memory_space<vmem>>, vector<1x12x32xf32>
    %3 = vector.shape_cast %2 : vector<1x12x32xf32> to vector<12x32xf32>
    %c0_5 = arith.constant 0 : index
    %c0_6 = arith.constant 0 : index
    %4 = vector.load %arg4[%c0_5, %c0_6] : memref<32x32xf32, #tpu.memory_space<vmem>>, vector<32x32xf32>
    %cst = arith.constant dense<0.000000e+00> : vector<16x32xf32>
    %5 = tpu.matmul %1, %4, %cst {dimension_numbers = #tpu.dot_dimension_numbers<[1], [0], [0], [1], [0, 0, 1, 1], [], []>} : vector<16x32xf32>, vector<32x32xf32>, vector<16x32xf32> -> vector<16x32xf32>
    %c0_7 = arith.constant 0 : index
    %c0_8 = arith.constant 0 : index
    %6 = vector.load %arg5[%c0_7, %c0_8] : memref<1x32xf32, #tpu.memory_space<vmem>>, vector<1x32xf32>
    %7 = vector.broadcast %6 : vector<1x32xf32> to vector<16x32xf32>
    %8 = arith.addf %5, %7 : vector<16x32xf32>
    %c0_9 = arith.constant 0 : index
    %c0_10 = arith.constant 0 : index
    %9 = vector.load %arg6[%c0_9, %c0_10] : memref<32x64xf32, #tpu.memory_space<vmem>>, vector<32x64xf32>
    %cst_11 = arith.constant dense<0.000000e+00> : vector<12x64xf32>
    %10 = tpu.matmul %3, %9, %cst_11 {dimension_numbers = #tpu.dot_dimension_numbers<[1], [0], [0], [1], [0, 0, 1, 1], [], []>} : vector<12x32xf32>, vector<32x64xf32>, vector<12x64xf32> -> vector<12x64xf32>
    %c0_12 = arith.constant 0 : index
    %c0_13 = arith.constant 0 : index
    %11 = vector.load %arg7[%c0_12, %c0_13] : memref<1x64xf32, #tpu.memory_space<vmem>>, vector<1x64xf32>
    %12 = vector.broadcast %11 : vector<1x64xf32> to vector<12x64xf32>
    %13 = arith.addf %10, %12 : vector<12x64xf32>
    %14 = vector.extract_strided_slice %13 {offsets = [0, 0], sizes = [12, 32], strides = [1, 1]} : vector<12x64xf32> to vector<12x32xf32>
    %15 = vector.extract_strided_slice %13 {offsets = [0, 32], sizes = [12, 32], strides = [1, 1]} : vector<12x64xf32> to vector<12x32xf32>
    %c0_14 = arith.constant 0 : index
    %c0_15 = arith.constant 0 : index
    %c0_16 = arith.constant 0 : index
    %16 = vector.load %arg3[%c0_14, %c0_15, %c0_16] : memref<1x16x12xf32, #tpu.memory_space<vmem>>, vector<1x16x12xf32>
    %17 = vector.shape_cast %16 : vector<1x16x12xf32> to vector<16x12xf32>
    %c0_17 = arith.constant 0 : index
    %c0_18 = arith.constant 0 : index
    %18 = vector.load %arg8[%c0_17, %c0_18] : memref<32x32xf32, #tpu.memory_space<vmem>>, vector<32x32xf32>
    %c0_19 = arith.constant 0 : index
    %c0_20 = arith.constant 0 : index
    %19 = vector.load %arg9[%c0_19, %c0_20] : memref<1x32xf32, #tpu.memory_space<vmem>>, vector<1x32xf32>
    %cst_21 = arith.constant 0.000000e+00 : f32
    %20 = vector.broadcast %cst_21 : f32 to vector<16x32xf32>
    %21 = vector.extract_strided_slice %8 {offsets = [0, 0], sizes = [16, 8], strides = [1, 1]} : vector<16x32xf32> to vector<16x8xf32>
    %cst_22 = arith.constant 0.353553385 : f32
    %22 = vector.broadcast %cst_22 : f32 to vector<16x8xf32>
    %23 = arith.mulf %21, %22 : vector<16x8xf32>
    %24 = vector.extract_strided_slice %14 {offsets = [0, 0], sizes = [12, 8], strides = [1, 1]} : vector<12x32xf32> to vector<12x8xf32>
    %25 = vector.extract_strided_slice %15 {offsets = [0, 0], sizes = [12, 8], strides = [1, 1]} : vector<12x32xf32> to vector<12x8xf32>
    %26 = tpu.transpose %24, [1, 0] : vector<12x8xf32> -> vector<8x12xf32>
    %cst_23 = arith.constant dense<0.000000e+00> : vector<16x12xf32>
    %27 = tpu.matmul %23, %26, %cst_23 {dimension_numbers = #tpu.dot_dimension_numbers<[1], [0], [0], [1], [0, 0, 1, 1], [], []>} : vector<16x8xf32>, vector<8x12xf32>, vector<16x12xf32> -> vector<16x12xf32>
    %28 = arith.addf %27, %17 : vector<16x12xf32>
    %cst_24 = arith.constant dense<0xFF800000> : vector<16xf32>
    %29 = vector.multi_reduction <maximumf>, %28, %cst_24 [1] : vector<16x12xf32> to vector<16xf32>
    %30 = vector.shape_cast %29 : vector<16xf32> to vector<16x1xf32>
    %31 = vector.broadcast %30 : vector<16x1xf32> to vector<16x12xf32>
    %32 = arith.subf %28, %31 : vector<16x12xf32>
    %33 = math.exp %32 : vector<16x12xf32>
    %cst_25 = arith.constant dense<0.000000e+00> : vector<16xf32>
    %34 = vector.multi_reduction <add>, %33, %cst_25 [1] : vector<16x12xf32> to vector<16xf32>
    %35 = vector.shape_cast %34 : vector<16xf32> to vector<16x1xf32>
    %36 = tpu.reciprocal %35 {approx = true} : vector<16x1xf32> -> vector<16x1xf32>
    %37 = vector.broadcast %36 : vector<16x1xf32> to vector<16x12xf32>
    %38 = arith.mulf %33, %37 : vector<16x12xf32>
    %cst_26 = arith.constant dense<0.000000e+00> : vector<16x8xf32>
    %39 = tpu.matmul %38, %25, %cst_26 {dimension_numbers = #tpu.dot_dimension_numbers<[1], [0], [0], [1], [0, 0, 1, 1], [], []>} : vector<16x12xf32>, vector<12x8xf32>, vector<16x8xf32> -> vector<16x8xf32>
    %40 = vector.extract_strided_slice %18 {offsets = [0, 0], sizes = [8, 32], strides = [1, 1]} : vector<32x32xf32> to vector<8x32xf32>
    %cst_27 = arith.constant dense<0.000000e+00> : vector<16x32xf32>
    %41 = tpu.matmul %39, %40, %cst_27 {dimension_numbers = #tpu.dot_dimension_numbers<[1], [0], [0], [1], [0, 0, 1, 1], [], []>} : vector<16x8xf32>, vector<8x32xf32>, vector<16x32xf32> -> vector<16x32xf32>
    %42 = arith.addf %20, %41 : vector<16x32xf32>
    %43 = vector.extract_strided_slice %8 {offsets = [0, 8], sizes = [16, 8], strides = [1, 1]} : vector<16x32xf32> to vector<16x8xf32>
    %cst_28 = arith.constant 0.353553385 : f32
    %44 = vector.broadcast %cst_28 : f32 to vector<16x8xf32>
    %45 = arith.mulf %43, %44 : vector<16x8xf32>
    %46 = vector.extract_strided_slice %14 {offsets = [0, 8], sizes = [12, 8], strides = [1, 1]} : vector<12x32xf32> to vector<12x8xf32>
    %47 = vector.extract_strided_slice %15 {offsets = [0, 8], sizes = [12, 8], strides = [1, 1]} : vector<12x32xf32> to vector<12x8xf32>
    %48 = tpu.transpose %46, [1, 0] : vector<12x8xf32> -> vector<8x12xf32>
    %cst_29 = arith.constant dense<0.000000e+00> : vector<16x12xf32>
    %49 = tpu.matmul %45, %48, %cst_29 {dimension_numbers = #tpu.dot_dimension_numbers<[1], [0], [0], [1], [0, 0, 1, 1], [], []>} : vector<16x8xf32>, vector<8x12xf32>, vector<16x12xf32> -> vector<16x12xf32>
    %50 = arith.addf %49, %17 : vector<16x12xf32>
    %cst_30 = arith.constant dense<0xFF800000> : vector<16xf32>
    %51 = vector.multi_reduction <maximumf>, %50, %cst_30 [1] : vector<16x12xf32> to vector<16xf32>
    %52 = vector.shape_cast %51 : vector<16xf32> to vector<16x1xf32>
    %53 = vector.broadcast %52 : vector<16x1xf32> to vector<16x12xf32>
    %54 = arith.subf %50, %53 : vector<16x12xf32>
    %55 = math.exp %54 : vector<16x12xf32>
    %cst_31 = arith.constant dense<0.000000e+00> : vector<16xf32>
    %56 = vector.multi_reduction <add>, %55, %cst_31 [1] : vector<16x12xf32> to vector<16xf32>
    %57 = vector.shape_cast %56 : vector<16xf32> to vector<16x1xf32>
    %58 = tpu.reciprocal %57 {approx = true} : vector<16x1xf32> -> vector<16x1xf32>
    %59 = vector.broadcast %58 : vector<16x1xf32> to vector<16x12xf32>
    %60 = arith.mulf %55, %59 : vector<16x12xf32>
    %cst_32 = arith.constant dense<0.000000e+00> : vector<16x8xf32>
    %61 = tpu.matmul %60, %47, %cst_32 {dimension_numbers = #tpu.dot_dimension_numbers<[1], [0], [0], [1], [0, 0, 1, 1], [], []>} : vector<16x12xf32>, vector<12x8xf32>, vector<16x8xf32> -> vector<16x8xf32>
    %62 = vector.extract_strided_slice %18 {offsets = [8, 0], sizes = [8, 32], strides = [1, 1]} : vector<32x32xf32> to vector<8x32xf32>
    %cst_33 = arith.constant dense<0.000000e+00> : vector<16x32xf32>
    %63 = tpu.matmul %61, %62, %cst_33 {dimension_numbers = #tpu.dot_dimension_numbers<[1], [0], [0], [1], [0, 0, 1, 1], [], []>} : vector<16x8xf32>, vector<8x32xf32>, vector<16x32xf32> -> vector<16x32xf32>
    %64 = arith.addf %42, %63 : vector<16x32xf32>
    %65 = vector.extract_strided_slice %8 {offsets = [0, 16], sizes = [16, 8], strides = [1, 1]} : vector<16x32xf32> to vector<16x8xf32>
    %cst_34 = arith.constant 0.353553385 : f32
    %66 = vector.broadcast %cst_34 : f32 to vector<16x8xf32>
    %67 = arith.mulf %65, %66 : vector<16x8xf32>
    %68 = vector.extract_strided_slice %14 {offsets = [0, 16], sizes = [12, 8], strides = [1, 1]} : vector<12x32xf32> to vector<12x8xf32>
    %69 = vector.extract_strided_slice %15 {offsets = [0, 16], sizes = [12, 8], strides = [1, 1]} : vector<12x32xf32> to vector<12x8xf32>
    %70 = tpu.transpose %68, [1, 0] : vector<12x8xf32> -> vector<8x12xf32>
    %cst_35 = arith.constant dense<0.000000e+00> : vector<16x12xf32>
    %71 = tpu.matmul %67, %70, %cst_35 {dimension_numbers = #tpu.dot_dimension_numbers<[1], [0], [0], [1], [0, 0, 1, 1], [], []>} : vector<16x8xf32>, vector<8x12xf32>, vector<16x12xf32> -> vector<16x12xf32>
    %72 = arith.addf %71, %17 : vector<16x12xf32>
    %cst_36 = arith.constant dense<0xFF800000> : vector<16xf32>
    %73 = vector.multi_reduction <maximumf>, %72, %cst_36 [1] : vector<16x12xf32> to vector<16xf32>
    %74 = vector.shape_cast %73 : vector<16xf32> to vector<16x1xf32>
    %75 = vector.broadcast %74 : vector<16x1xf32> to vector<16x12xf32>
    %76 = arith.subf %72, %75 : vector<16x12xf32>
    %77 = math.exp %76 : vector<16x12xf32>
    %cst_37 = arith.constant dense<0.000000e+00> : vector<16xf32>
    %78 = vector.multi_reduction <add>, %77, %cst_37 [1] : vector<16x12xf32> to vector<16xf32>
    %79 = vector.shape_cast %78 : vector<16xf32> to vector<16x1xf32>
    %80 = tpu.reciprocal %79 {approx = true} : vector<16x1xf32> -> vector<16x1xf32>
    %81 = vector.broadcast %80 : vector<16x1xf32> to vector<16x12xf32>
    %82 = arith.mulf %77, %81 : vector<16x12xf32>
    %cst_38 = arith.constant dense<0.000000e+00> : vector<16x8xf32>
    %83 = tpu.matmul %82, %69, %cst_38 {dimension_numbers = #tpu.dot_dimension_numbers<[1], [0], [0], [1], [0, 0, 1, 1], [], []>} : vector<16x12xf32>, vector<12x8xf32>, vector<16x8xf32> -> vector<16x8xf32>
    %84 = vector.extract_strided_slice %18 {offsets = [16, 0], sizes = [8, 32], strides = [1, 1]} : vector<32x32xf32> to vector<8x32xf32>
    %cst_39 = arith.constant dense<0.000000e+00> : vector<16x32xf32>
    %85 = tpu.matmul %83, %84, %cst_39 {dimension_numbers = #tpu.dot_dimension_numbers<[1], [0], [0], [1], [0, 0, 1, 1], [], []>} : vector<16x8xf32>, vector<8x32xf32>, vector<16x32xf32> -> vector<16x32xf32>
    %86 = arith.addf %64, %85 : vector<16x32xf32>
    %87 = vector.extract_strided_slice %8 {offsets = [0, 24], sizes = [16, 8], strides = [1, 1]} : vector<16x32xf32> to vector<16x8xf32>
    %cst_40 = arith.constant 0.353553385 : f32
    %88 = vector.broadcast %cst_40 : f32 to vector<16x8xf32>
    %89 = arith.mulf %87, %88 : vector<16x8xf32>
    %90 = vector.extract_strided_slice %14 {offsets = [0, 24], sizes = [12, 8], strides = [1, 1]} : vector<12x32xf32> to vector<12x8xf32>
    %91 = vector.extract_strided_slice %15 {offsets = [0, 24], sizes = [12, 8], strides = [1, 1]} : vector<12x32xf32> to vector<12x8xf32>
    %92 = tpu.transpose %90, [1, 0] : vector<12x8xf32> -> vector<8x12xf32>
    %cst_41 = arith.constant dense<0.000000e+00> : vector<16x12xf32>
    %93 = tpu.matmul %89, %92, %cst_41 {dimension_numbers = #tpu.dot_dimension_numbers<[1], [0], [0], [1], [0, 0, 1, 1], [], []>} : vector<16x8xf32>, vector<8x12xf32>, vector<16x12xf32> -> vector<16x12xf32>
    %94 = arith.addf %93, %17 : vector<16x12xf32>
    %cst_42 = arith.constant dense<0xFF800000> : vector<16xf32>
    %95 = vector.multi_reduction <maximumf>, %94, %cst_42 [1] : vector<16x12xf32> to vector<16xf32>
    %96 = vector.shape_cast %95 : vector<16xf32> to vector<16x1xf32>
    %97 = vector.broadcast %96 : vector<16x1xf32> to vector<16x12xf32>
    %98 = arith.subf %94, %97 : vector<16x12xf32>
    %99 = math.exp %98 : vector<16x12xf32>
    %cst_43 = arith.constant dense<0.000000e+00> : vector<16xf32>
    %100 = vector.multi_reduction <add>, %99, %cst_43 [1] : vector<16x12xf32> to vector<16xf32>
    %101 = vector.shape_cast %100 : vector<16xf32> to vector<16x1xf32>
    %102 = tpu.reciprocal %101 {approx = true} : vector<16x1xf32> -> vector<16x1xf32>
    %103 = vector.broadcast %102 : vector<16x1xf32> to vector<16x12xf32>
    %104 = arith.mulf %99, %103 : vector<16x12xf32>
    %cst_44 = arith.constant dense<0.000000e+00> : vector<16x8xf32>
    %105 = tpu.matmul %104, %91, %cst_44 {dimension_numbers = #tpu.dot_dimension_numbers<[1], [0], [0], [1], [0, 0, 1, 1], [], []>} : vector<16x12xf32>, vector<12x8xf32>, vector<16x8xf32> -> vector<16x8xf32>
    %106 = vector.extract_strided_slice %18 {offsets = [24, 0], sizes = [8, 32], strides = [1, 1]} : vector<32x32xf32> to vector<8x32xf32>
    %cst_45 = arith.constant dense<0.000000e+00> : vector<16x32xf32>
    %107 = tpu.matmul %105, %106, %cst_45 {dimension_numbers = #tpu.dot_dimension_numbers<[1], [0], [0], [1], [0, 0, 1, 1], [], []>} : vector<16x8xf32>, vector<8x32xf32>, vector<16x32xf32> -> vector<16x32xf32>
    %108 = arith.addf %86, %107 : vector<16x32xf32>
    %109 = vector.broadcast %19 : vector<1x32xf32> to vector<16x32xf32>
    %110 = arith.addf %108, %109 : vector<16x32xf32>
    %111 = arith.addf %1, %110 : vector<16x32xf32>
    %c0_46 = arith.constant 0 : index
    %c0_47 = arith.constant 0 : index
    %112 = vector.load %arg10[%c0_46, %c0_47] : memref<1x32xf32, #tpu.memory_space<vmem>>, vector<1x32xf32>
    %c0_48 = arith.constant 0 : index
    %c0_49 = arith.constant 0 : index
    %113 = vector.load %arg11[%c0_48, %c0_49] : memref<1x32xf32, #tpu.memory_space<vmem>>, vector<1x32xf32>
    %cst_50 = arith.constant dense<0.000000e+00> : vector<16xf32>
    %114 = vector.multi_reduction <add>, %111, %cst_50 [1] : vector<16x32xf32> to vector<16xf32>
    %115 = vector.shape_cast %114 : vector<16xf32> to vector<16x1xf32>
    %cst_51 = arith.constant 3.200000e+01 : f32
    %116 = vector.broadcast %cst_51 : f32 to vector<16x1xf32>
    %117 = arith.divf %115, %116 : vector<16x1xf32>
    %118 = vector.broadcast %117 : vector<16x1xf32> to vector<16x32xf32>
    %119 = arith.subf %111, %118 : vector<16x32xf32>
    %120 = arith.mulf %119, %119 : vector<16x32xf32>
    %cst_52 = arith.constant dense<0.000000e+00> : vector<16xf32>
    %121 = vector.multi_reduction <add>, %120, %cst_52 [1] : vector<16x32xf32> to vector<16xf32>
    %122 = vector.shape_cast %121 : vector<16xf32> to vector<16x1xf32>
    %cst_53 = arith.constant 3.200000e+01 : f32
    %123 = vector.broadcast %cst_53 : f32 to vector<16x1xf32>
    %124 = arith.divf %122, %123 : vector<16x1xf32>
    %125 = vector.broadcast %117 : vector<16x1xf32> to vector<16x32xf32>
    %126 = arith.subf %111, %125 : vector<16x32xf32>
    %cst_54 = arith.constant 9.99999974E-6 : f32
    %127 = vector.broadcast %cst_54 : f32 to vector<16x1xf32>
    %128 = arith.addf %124, %127 : vector<16x1xf32>
    %129 = math.rsqrt %128 : vector<16x1xf32>
    %130 = vector.broadcast %129 : vector<16x1xf32> to vector<16x32xf32>
    %131 = arith.mulf %126, %130 : vector<16x32xf32>
    %132 = vector.broadcast %112 : vector<1x32xf32> to vector<16x32xf32>
    %133 = arith.mulf %131, %132 : vector<16x32xf32>
    %134 = vector.broadcast %113 : vector<1x32xf32> to vector<16x32xf32>
    %135 = arith.addf %133, %134 : vector<16x32xf32>
    %c0_55 = arith.constant 0 : index
    %c0_56 = arith.constant 0 : index
    %c0_57 = arith.constant 0 : index
    %136 = vector.load %arg12[%c0_55, %c0_56, %c0_57] : memref<1x16x32xf32, #tpu.memory_space<vmem>>, vector<1x16x32xf32>
    %137 = vector.shape_cast %136 : vector<1x16x32xf32> to vector<16x32xf32>
    %138 = vector.shape_cast %135 : vector<16x32xf32> to vector<1x16x32xf32>
    tpu.vector_store %arg12[%c0_55, %c0_56, %c0_57], %138 {strides = array<i32>} : memref<1x16x32xf32, #tpu.memory_space<vmem>>, vector<1x16x32xf32>,
    return
  }
  func.func @transform_0(%arg0: i32) -> (i32, i32, i32) {
    %c0_i32 = arith.constant 0 : i32
    %c0_i32_0 = arith.constant 0 : i32
    %c0_i32_1 = arith.constant 0 : i32
    return %arg0, %c0_i32, %c0_i32_0 : i32, i32, i32
  }
  func.func @transform_1(%arg0: i32) -> (i32, i32, i32) {
    %c0_i32 = arith.constant 0 : i32
    %c0_i32_0 = arith.constant 0 : i32
    %c0_i32_1 = arith.constant 0 : i32
    return %arg0, %c0_i32, %c0_i32_0 : i32, i32, i32
  }
  func.func @transform_2(%arg0: i32) -> (i32, i32, i32) {
    %c0_i32 = arith.constant 0 : i32
    %c0_i32_0 = arith.constant 0 : i32
    %c0_i32_1 = arith.constant 0 : i32
    return %arg0, %c0_i32, %c0_i32_0 : i32, i32, i32
  }
  func.func @transform_3(%arg0: i32) -> (i32, i32) {
    %c0_i32 = arith.constant 0 : i32
    %c0_i32_0 = arith.constant 0 : i32
    %c0_i32_1 = arith.constant 0 : i32
    return %c0_i32, %c0_i32_0 : i32, i32
  }
  func.func @transform_4(%arg0: i32) -> (i32, i32) {
    %c0_i32 = arith.constant 0 : i32
    %c0_i32_0 = arith.constant 0 : i32
    %c0_i32_1 = arith.constant 0 : i32
    return %c0_i32, %c0_i32_0 : i32, i32
  }
  func.func @transform_5(%arg0: i32) -> (i32, i32) {
    %c0_i32 = arith.constant 0 : i32
    %c0_i32_0 = arith.constant 0 : i32
    %c0_i32_1 = arith.constant 0 : i32
    return %c0_i32, %c0_i32_0 : i32, i32
  }
  func.func @transform_6(%arg0: i32) -> (i32, i32) {
    %c0_i32 = arith.constant 0 : i32
    %c0_i32_0 = arith.constant 0 : i32
    %c0_i32_1 = arith.constant 0 : i32
    return %c0_i32, %c0_i32_0 : i32, i32
  }
  func.func @transform_7(%arg0: i32) -> (i32, i32) {
    %c0_i32 = arith.constant 0 : i32
    %c0_i32_0 = arith.constant 0 : i32
    %c0_i32_1 = arith.constant 0 : i32
    return %c0_i32, %c0_i32_0 : i32, i32
  }
  func.func @transform_8(%arg0: i32) -> (i32, i32) {
    %c0_i32 = arith.constant 0 : i32
    %c0_i32_0 = arith.constant 0 : i32
    %c0_i32_1 = arith.constant 0 : i32
    return %c0_i32, %c0_i32_0 : i32, i32
  }
  func.func @transform_9(%arg0: i32) -> (i32, i32) {
    %c0_i32 = arith.constant 0 : i32
    %c0_i32_0 = arith.constant 0 : i32
    %c0_i32_1 = arith.constant 0 : i32
    return %c0_i32, %c0_i32_0 : i32, i32
  }
  func.func @transform_10(%arg0: i32) -> (i32, i32) {
    %c0_i32 = arith.constant 0 : i32
    %c0_i32_0 = arith.constant 0 : i32
    %c0_i32_1 = arith.constant 0 : i32
    return %c0_i32, %c0_i32_0 : i32, i32
  }
  func.func @transform_11(%arg0: i32) -> (i32, i32, i32) {
    %c0_i32 = arith.constant 0 : i32
    %c0_i32_0 = arith.constant 0 : i32
    %c0_i32_1 = arith.constant 0 : i32
    return %arg0, %c0_i32, %c0_i32_0 : i32, i32, i32
  }
}

module attributes {stable_mosaic.version = 11 : i64} {
  func.func @_ffn_block_kernel(%arg0: i32, %arg1: memref<1x16x32xf32, #tpu.memory_space<vmem>>, %arg2: memref<1x16x1xf32, #tpu.memory_space<vmem>>, %arg3: memref<3x32x64xf32, #tpu.memory_space<vmem>>, %arg4: memref<1x64xf32, #tpu.memory_space<vmem>>, %arg5: memref<3x64x32xf32, #tpu.memory_space<vmem>>, %arg6: memref<1x32xf32, #tpu.memory_space<vmem>>, %arg7: memref<1x32xf32, #tpu.memory_space<vmem>>, %arg8: memref<1x32xf32, #tpu.memory_space<vmem>>, %arg9: memref<1x16x32xf32, #tpu.memory_space<vmem>>) attributes {dimension_semantics = [#tpu.dimension_semantics<parallel>], iteration_bounds = array<i64: 2>, scalar_prefetch = 0 : i64, scratch_operands = 0 : i64, tpu.core_type = #tpu.core_type<tc>, window_params = [{transform_indices = @transform_0, window_bounds = array<i64: 1, 16, 32>}, {transform_indices = @transform_1, window_bounds = array<i64: 1, 16, 1>}, {pipeline_mode = #tpu.pipeline_mode<synchronous>, transform_indices = @transform_2, window_bounds = array<i64: 3, 32, 64>}, {pipeline_mode = #tpu.pipeline_mode<synchronous>, transform_indices = @transform_3, window_bounds = array<i64: 1, 64>}, {pipeline_mode = #tpu.pipeline_mode<synchronous>, transform_indices = @transform_4, window_bounds = array<i64: 3, 64, 32>}, {pipeline_mode = #tpu.pipeline_mode<synchronous>, transform_indices = @transform_5, window_bounds = array<i64: 1, 32>}, {pipeline_mode = #tpu.pipeline_mode<synchronous>, transform_indices = @transform_6, window_bounds = array<i64: 1, 32>}, {pipeline_mode = #tpu.pipeline_mode<synchronous>, transform_indices = @transform_7, window_bounds = array<i64: 1, 32>}, {transform_indices = @transform_8, window_bounds = array<i64: 1, 16, 32>}]} {
    %c0 = arith.constant 0 : index
    %c0_0 = arith.constant 0 : index
    %c0_1 = arith.constant 0 : index
    %0 = vector.load %arg1[%c0, %c0_0, %c0_1] : memref<1x16x32xf32, #tpu.memory_space<vmem>>, vector<1x16x32xf32>
    %1 = vector.shape_cast %0 : vector<1x16x32xf32> to vector<16x32xf32>
    %c0_2 = arith.constant 0 : index
    %c0_3 = arith.constant 0 : index
    %c0_4 = arith.constant 0 : index
    %2 = vector.load %arg2[%c0_2, %c0_3, %c0_4] : memref<1x16x1xf32, #tpu.memory_space<vmem>>, vector<1x16x1xf32>
    %3 = vector.shape_cast %2 : vector<1x16x1xf32> to vector<16x1xf32>
    %4 = tpu.iota {dimensions = array<i32: 0>} : vector<16x16xi32>
    %5 = tpu.iota {dimensions = array<i32: 1>} : vector<16x16xi32>
    %6 = arith.subi %4, %5 : vector<16x16xi32>
    %c1_i32 = arith.constant 1 : i32
    %7 = vector.broadcast %c1_i32 : i32 to vector<16x16xi32>
    %8 = arith.cmpi eq, %6, %7 : vector<16x16xi32>
    %9 = arith.extui %8 : vector<16x16xi1> to vector<16x16xi32>
    %10 = arith.sitofp %9 : vector<16x16xi32> to vector<16x16xf32>
    %11 = tpu.iota {dimensions = array<i32: 0>} : vector<16x16xi32>
    %12 = tpu.iota {dimensions = array<i32: 1>} : vector<16x16xi32>
    %13 = arith.subi %11, %12 : vector<16x16xi32>
    %c2_i32 = arith.constant 2 : i32
    %14 = vector.broadcast %c2_i32 : i32 to vector<16x16xi32>
    %15 = arith.cmpi eq, %13, %14 : vector<16x16xi32>
    %16 = arith.extui %15 : vector<16x16xi1> to vector<16x16xi32>
    %17 = arith.sitofp %16 : vector<16x16xi32> to vector<16x16xf32>
    %18 = vector.broadcast %3 : vector<16x1xf32> to vector<16x32xf32>
    %19 = arith.mulf %1, %18 : vector<16x32xf32>
    %c0_5 = arith.constant 0 : index
    %c0_6 = arith.constant 0 : index
    %c0_7 = arith.constant 0 : index
    %20 = vector.load %arg3[%c0_5, %c0_6, %c0_7] : memref<3x32x64xf32, #tpu.memory_space<vmem>>, vector<3x32x64xf32>
    %c0_8 = arith.constant 0 : index
    %c0_9 = arith.constant 0 : index
    %21 = vector.load %arg4[%c0_8, %c0_9] : memref<1x64xf32, #tpu.memory_space<vmem>>, vector<1x64xf32>
    %22 = vector.extract_strided_slice %20 {offsets = [2, 0, 0], sizes = [1, 32, 64], strides = [1, 1, 1]} : vector<3x32x64xf32> to vector<1x32x64xf32>
    %23 = vector.shape_cast %22 : vector<1x32x64xf32> to vector<32x64xf32>
    %cst = arith.constant dense<0.000000e+00> : vector<16x64xf32>
    %24 = tpu.matmul %19, %23, %cst {dimension_numbers = #tpu.dot_dimension_numbers<[1], [0], [0], [1], [0, 0, 1, 1], [], []>} : vector<16x32xf32>, vector<32x64xf32>, vector<16x64xf32> -> vector<16x64xf32>
    %cst_10 = arith.constant dense<0.000000e+00> : vector<16x32xf32>
    %25 = tpu.matmul %17, %19, %cst_10 {dimension_numbers = #tpu.dot_dimension_numbers<[1], [0], [0], [1], [0, 0, 1, 1], [], []>} : vector<16x16xf32>, vector<16x32xf32>, vector<16x32xf32> -> vector<16x32xf32>
    %26 = vector.extract_strided_slice %20 {offsets = [0, 0, 0], sizes = [1, 32, 64], strides = [1, 1, 1]} : vector<3x32x64xf32> to vector<1x32x64xf32>
    %27 = vector.shape_cast %26 : vector<1x32x64xf32> to vector<32x64xf32>
    %cst_11 = arith.constant dense<0.000000e+00> : vector<16x64xf32>
    %28 = tpu.matmul %25, %27, %cst_11 {dimension_numbers = #tpu.dot_dimension_numbers<[1], [0], [0], [1], [0, 0, 1, 1], [], []>} : vector<16x32xf32>, vector<32x64xf32>, vector<16x64xf32> -> vector<16x64xf32>
    %29 = arith.addf %24, %28 : vector<16x64xf32>
    %cst_12 = arith.constant dense<0.000000e+00> : vector<16x32xf32>
    %30 = tpu.matmul %10, %19, %cst_12 {dimension_numbers = #tpu.dot_dimension_numbers<[1], [0], [0], [1], [0, 0, 1, 1], [], []>} : vector<16x16xf32>, vector<16x32xf32>, vector<16x32xf32> -> vector<16x32xf32>
    %31 = vector.extract_strided_slice %20 {offsets = [1, 0, 0], sizes = [1, 32, 64], strides = [1, 1, 1]} : vector<3x32x64xf32> to vector<1x32x64xf32>
    %32 = vector.shape_cast %31 : vector<1x32x64xf32> to vector<32x64xf32>
    %cst_13 = arith.constant dense<0.000000e+00> : vector<16x64xf32>
    %33 = tpu.matmul %30, %32, %cst_13 {dimension_numbers = #tpu.dot_dimension_numbers<[1], [0], [0], [1], [0, 0, 1, 1], [], []>} : vector<16x32xf32>, vector<32x64xf32>, vector<16x64xf32> -> vector<16x64xf32>
    %34 = arith.addf %29, %33 : vector<16x64xf32>
    %35 = vector.broadcast %21 : vector<1x64xf32> to vector<16x64xf32>
    %36 = arith.addf %34, %35 : vector<16x64xf32>
    %cst_14 = arith.constant 0.000000e+00 : f32
    %37 = vector.broadcast %cst_14 : f32 to vector<16x64xf32>
    %38 = arith.maximumf %36, %37 : vector<16x64xf32>
    %39 = vector.broadcast %3 : vector<16x1xf32> to vector<16x64xf32>
    %40 = arith.mulf %38, %39 : vector<16x64xf32>
    %c0_15 = arith.constant 0 : index
    %c0_16 = arith.constant 0 : index
    %c0_17 = arith.constant 0 : index
    %41 = vector.load %arg5[%c0_15, %c0_16, %c0_17] : memref<3x64x32xf32, #tpu.memory_space<vmem>>, vector<3x64x32xf32>
    %c0_18 = arith.constant 0 : index
    %c0_19 = arith.constant 0 : index
    %42 = vector.load %arg6[%c0_18, %c0_19] : memref<1x32xf32, #tpu.memory_space<vmem>>, vector<1x32xf32>
    %43 = vector.extract_strided_slice %41 {offsets = [2, 0, 0], sizes = [1, 64, 32], strides = [1, 1, 1]} : vector<3x64x32xf32> to vector<1x64x32xf32>
    %44 = vector.shape_cast %43 : vector<1x64x32xf32> to vector<64x32xf32>
    %cst_20 = arith.constant dense<0.000000e+00> : vector<16x32xf32>
    %45 = tpu.matmul %40, %44, %cst_20 {dimension_numbers = #tpu.dot_dimension_numbers<[1], [0], [0], [1], [0, 0, 1, 1], [], []>} : vector<16x64xf32>, vector<64x32xf32>, vector<16x32xf32> -> vector<16x32xf32>
    %cst_21 = arith.constant dense<0.000000e+00> : vector<16x64xf32>
    %46 = tpu.matmul %17, %40, %cst_21 {dimension_numbers = #tpu.dot_dimension_numbers<[1], [0], [0], [1], [0, 0, 1, 1], [], []>} : vector<16x16xf32>, vector<16x64xf32>, vector<16x64xf32> -> vector<16x64xf32>
    %47 = vector.extract_strided_slice %41 {offsets = [0, 0, 0], sizes = [1, 64, 32], strides = [1, 1, 1]} : vector<3x64x32xf32> to vector<1x64x32xf32>
    %48 = vector.shape_cast %47 : vector<1x64x32xf32> to vector<64x32xf32>
    %cst_22 = arith.constant dense<0.000000e+00> : vector<16x32xf32>
    %49 = tpu.matmul %46, %48, %cst_22 {dimension_numbers = #tpu.dot_dimension_numbers<[1], [0], [0], [1], [0, 0, 1, 1], [], []>} : vector<16x64xf32>, vector<64x32xf32>, vector<16x32xf32> -> vector<16x32xf32>
    %50 = arith.addf %45, %49 : vector<16x32xf32>
    %cst_23 = arith.constant dense<0.000000e+00> : vector<16x64xf32>
    %51 = tpu.matmul %10, %40, %cst_23 {dimension_numbers = #tpu.dot_dimension_numbers<[1], [0], [0], [1], [0, 0, 1, 1], [], []>} : vector<16x16xf32>, vector<16x64xf32>, vector<16x64xf32> -> vector<16x64xf32>
    %52 = vector.extract_strided_slice %41 {offsets = [1, 0, 0], sizes = [1, 64, 32], strides = [1, 1, 1]} : vector<3x64x32xf32> to vector<1x64x32xf32>
    %53 = vector.shape_cast %52 : vector<1x64x32xf32> to vector<64x32xf32>
    %cst_24 = arith.constant dense<0.000000e+00> : vector<16x32xf32>
    %54 = tpu.matmul %51, %53, %cst_24 {dimension_numbers = #tpu.dot_dimension_numbers<[1], [0], [0], [1], [0, 0, 1, 1], [], []>} : vector<16x64xf32>, vector<64x32xf32>, vector<16x32xf32> -> vector<16x32xf32>
    %55 = arith.addf %50, %54 : vector<16x32xf32>
    %56 = vector.broadcast %42 : vector<1x32xf32> to vector<16x32xf32>
    %57 = arith.addf %55, %56 : vector<16x32xf32>
    %58 = vector.broadcast %3 : vector<16x1xf32> to vector<16x32xf32>
    %59 = arith.mulf %57, %58 : vector<16x32xf32>
    %60 = arith.addf %1, %59 : vector<16x32xf32>
    %c0_25 = arith.constant 0 : index
    %c0_26 = arith.constant 0 : index
    %61 = vector.load %arg7[%c0_25, %c0_26] : memref<1x32xf32, #tpu.memory_space<vmem>>, vector<1x32xf32>
    %c0_27 = arith.constant 0 : index
    %c0_28 = arith.constant 0 : index
    %62 = vector.load %arg8[%c0_27, %c0_28] : memref<1x32xf32, #tpu.memory_space<vmem>>, vector<1x32xf32>
    %cst_29 = arith.constant dense<0.000000e+00> : vector<16xf32>
    %63 = vector.multi_reduction <add>, %60, %cst_29 [1] : vector<16x32xf32> to vector<16xf32>
    %64 = vector.shape_cast %63 : vector<16xf32> to vector<16x1xf32>
    %cst_30 = arith.constant 3.200000e+01 : f32
    %65 = vector.broadcast %cst_30 : f32 to vector<16x1xf32>
    %66 = arith.divf %64, %65 : vector<16x1xf32>
    %67 = vector.broadcast %66 : vector<16x1xf32> to vector<16x32xf32>
    %68 = arith.subf %60, %67 : vector<16x32xf32>
    %69 = arith.mulf %68, %68 : vector<16x32xf32>
    %cst_31 = arith.constant dense<0.000000e+00> : vector<16xf32>
    %70 = vector.multi_reduction <add>, %69, %cst_31 [1] : vector<16x32xf32> to vector<16xf32>
    %71 = vector.shape_cast %70 : vector<16xf32> to vector<16x1xf32>
    %cst_32 = arith.constant 3.200000e+01 : f32
    %72 = vector.broadcast %cst_32 : f32 to vector<16x1xf32>
    %73 = arith.divf %71, %72 : vector<16x1xf32>
    %74 = vector.broadcast %66 : vector<16x1xf32> to vector<16x32xf32>
    %75 = arith.subf %60, %74 : vector<16x32xf32>
    %cst_33 = arith.constant 9.99999974E-6 : f32
    %76 = vector.broadcast %cst_33 : f32 to vector<16x1xf32>
    %77 = arith.addf %73, %76 : vector<16x1xf32>
    %78 = math.rsqrt %77 : vector<16x1xf32>
    %79 = vector.broadcast %78 : vector<16x1xf32> to vector<16x32xf32>
    %80 = arith.mulf %75, %79 : vector<16x32xf32>
    %81 = vector.broadcast %61 : vector<1x32xf32> to vector<16x32xf32>
    %82 = arith.mulf %80, %81 : vector<16x32xf32>
    %83 = vector.broadcast %62 : vector<1x32xf32> to vector<16x32xf32>
    %84 = arith.addf %82, %83 : vector<16x32xf32>
    %c0_34 = arith.constant 0 : index
    %c0_35 = arith.constant 0 : index
    %c0_36 = arith.constant 0 : index
    %85 = vector.load %arg9[%c0_34, %c0_35, %c0_36] : memref<1x16x32xf32, #tpu.memory_space<vmem>>, vector<1x16x32xf32>
    %86 = vector.shape_cast %85 : vector<1x16x32xf32> to vector<16x32xf32>
    %87 = vector.shape_cast %84 : vector<16x32xf32> to vector<1x16x32xf32>
    tpu.vector_store %arg9[%c0_34, %c0_35, %c0_36], %87 {strides = array<i32>} : memref<1x16x32xf32, #tpu.memory_space<vmem>>, vector<1x16x32xf32>,
    return
  }
  func.func @transform_0(%arg0: i32) -> (i32, i32, i32) {
    %c0_i32 = arith.constant 0 : i32
    %c0_i32_0 = arith.constant 0 : i32
    %c0_i32_1 = arith.constant 0 : i32
    return %arg0, %c0_i32, %c0_i32_0 : i32, i32, i32
  }
  func.func @transform_1(%arg0: i32) -> (i32, i32, i32) {
    %c0_i32 = arith.constant 0 : i32
    %c0_i32_0 = arith.constant 0 : i32
    %c0_i32_1 = arith.constant 0 : i32
    return %arg0, %c0_i32, %c0_i32_0 : i32, i32, i32
  }
  func.func @transform_2(%arg0: i32) -> (i32, i32, i32) {
    %c0_i32 = arith.constant 0 : i32
    %c0_i32_0 = arith.constant 0 : i32
    %c0_i32_1 = arith.constant 0 : i32
    %c0_i32_2 = arith.constant 0 : i32
    return %c0_i32, %c0_i32_0, %c0_i32_1 : i32, i32, i32
  }
  func.func @transform_3(%arg0: i32) -> (i32, i32) {
    %c0_i32 = arith.constant 0 : i32
    %c0_i32_0 = arith.constant 0 : i32
    %c0_i32_1 = arith.constant 0 : i32
    return %c0_i32, %c0_i32_0 : i32, i32
  }
  func.func @transform_4(%arg0: i32) -> (i32, i32, i32) {
    %c0_i32 = arith.constant 0 : i32
    %c0_i32_0 = arith.constant 0 : i32
    %c0_i32_1 = arith.constant 0 : i32
    %c0_i32_2 = arith.constant 0 : i32
    return %c0_i32, %c0_i32_0, %c0_i32_1 : i32, i32, i32
  }
  func.func @transform_5(%arg0: i32) -> (i32, i32) {
    %c0_i32 = arith.constant 0 : i32
    %c0_i32_0 = arith.constant 0 : i32
    %c0_i32_1 = arith.constant 0 : i32
    return %c0_i32, %c0_i32_0 : i32, i32
  }
  func.func @transform_6(%arg0: i32) -> (i32, i32) {
    %c0_i32 = arith.constant 0 : i32
    %c0_i32_0 = arith.constant 0 : i32
    %c0_i32_1 = arith.constant 0 : i32
    return %c0_i32, %c0_i32_0 : i32, i32
  }
  func.func @transform_7(%arg0: i32) -> (i32, i32) {
    %c0_i32 = arith.constant 0 : i32
    %c0_i32_0 = arith.constant 0 : i32
    %c0_i32_1 = arith.constant 0 : i32
    return %c0_i32, %c0_i32_0 : i32, i32
  }
  func.func @transform_8(%arg0: i32) -> (i32, i32, i32) {
    %c0_i32 = arith.constant 0 : i32
    %c0_i32_0 = arith.constant 0 : i32
    %c0_i32_1 = arith.constant 0 : i32
    return %arg0, %c0_i32, %c0_i32_0 : i32, i32, i32
  }
}

</mosaic_0001>

<bundles_post_ra>
// kernel: decoder_forward.8
= control target key start
LH: loop header
LB: loop body
LE: loop exit
PB: predicated region body
PF: predicated region fallthrough
CT: control target
= control target key end

     0   :  { %s1734_s27 = smov 0   ;;  %s1935_s0 = inlined_call_operand.vmem [shape: f32[2,16,32], index: 0, kind: input, shape index: {}]   ;;  %s1936_s1 = inlined_call_operand.vmem [shape: f32[2,16,1], index: 1, kind: input, shape index: {}]   ;;  %s1937_s2 = inlined_call_operand.vmem [shape: f32[3,32,64], index: 2, kind: input, shape index: {}]   ;;  %s1938_s3 = inlined_call_operand.vmem [shape: f32[1,64], index: 3, kind: input, shape index: {}]   ;;  %s1939_s4 = inlined_call_operand.vmem [shape: f32[3,64,32], index: 4, kind: input, shape index: {}]   ;;  %s1940_s5 = inlined_call_operand.vmem [shape: f32[1,32], index: 5, kind: input, shape index: {}]   ;;  %s1941_s6 = inlined_call_operand.vmem [shape: f32[1,32], index: 6, kind: input, shape index: {}]   ;;  %s1942_s7 = inlined_call_operand.vmem [shape: f32[1,32], index: 7, kind: input, shape index: {}]   ;;  %s1943_s8 = inlined_call_operand.vmem [shape: f32[2,16,32], index: 8, kind: output, shape index: {}]  }
   0x1 LB: > { %s1342_s28 = sadd.s32 4294967295, %s1685_s27   ;;  %p1346_p0 = scmp.ge.s32.totalorder %s1685_s27, 1  ;;  %s1685_s27 = sphi %s1734_s27, %s18_s27  }
   0x2   : > { %p272_p1 = scmp.lt.s32.totalorder %s1685_s27, 3 }
   0x4   : > { %p273_p2 = pnand %p1346_p0, %p272_p1 }
   0x5   : > { %p311_p3 = scmp.lt.s32.totalorder (!%p273_p2), %s1342_s28, 1  ;;  %v1687_v0 = vmov (!%p273_p2), 0   ;;  %v330_v3 = vlaneseq (!%p273_p2)  ;;  %v1688_v9 = vmov (!%p273_p2), 0.0   ;;  %vm374_vm1 = vcmask (!%p273_p2), 130048   ;;  %v361_v14 = vld [vmem:[%s1937_s2] sm:$0xff] (!%p273_p2)  ;;  %v362_v15 = vld [vmem:[%s1937_s2 + $0x8] sm:$0xff] (!%p273_p2) }
   0x6   : > { %276 = sbr.rel (%p273_p2) target bundleno = 1583 (0x62f), region = 52  ;;  %1674 = vset.pattern.permute.xlu0 (!%p273_p2), %v1687_v0  ;;  %v363_v16 = vld [vmem:[%s1937_s2 + $0x10] sm:$0xff] (!%p273_p2)  ;;  %v1572_v17 = vpack.c.bf16 (!%p273_p2), %v362_v15, %v361_v14  ;;  %v364_v18 = vld [vmem:[%s1937_s2 + $0x18] sm:$0xff] (!%p273_p2)  ;;  %v369_v27 = vld [vmem:[%s1937_s2 + $0x40] sm:$0xff] (!%p273_p2)  ;;  %vm456_vm5 = vcmask (!%p273_p2), 261120   ;;  %vm895_vm6 = vcmask (!%p273_p2), 523264  }
   0x7   : > { %v331_v4 = vshrl.u32 (!%p273_p2), %v330_v3, 7  ;;  %v334_v5 = vand.u32 (!%p273_p2), 127, %v330_v3  ;;  %v1576_v19 = vpack.c.bf16 (!%p273_p2), %v364_v18, %v363_v16  ;;  %v370_v28 = vld [vmem:[%s1937_s2 + $0x48] sm:$0xff] (!%p273_p2)  ;;  %v371_v30 = vld [vmem:[%s1937_s2 + $0x50] sm:$0xff] (!%p273_p2)  ;;  %v372_v31 = vld [vmem:[%s1937_s2 + $0x58] sm:$0xff] (!%p273_p2) }
   0x8   : > { %1573 = vmatprep.subr.bf16.mxu1 (!%p273_p2), %v1572_v17  ;;  %v1580_v29 = vpack.c.bf16 (!%p273_p2), %v370_v28, %v369_v27  ;;  %v1584_v34 = vpack.c.bf16 (!%p273_p2), %v372_v31, %v371_v30  ;;  %v365_v35 = vld [vmem:[%s1937_s2 + $0x20] sm:$0xff] (!%p273_p2)  ;;  %v366_v36 = vld [vmem:[%s1937_s2 + $0x28] sm:$0xff] (!%p273_p2)  ;;  %v367_v40 = vld [vmem:[%s1937_s2 + $0x30] sm:$0xff] (!%p273_p2) }
   0x9   : > { %v332_v6 = vadd.s32 (!%p273_p2), 8, %v331_v4  ;;  %v335_v7 = vsub.s32 (!%p273_p2), %v331_v4, %v334_v5  ;;  %1575 = vmatpush3.bf16.msra.mxu1 (!%p273_p2), %v1572_v17  ;;  %v1592_v38 = vpack.c.bf16 (!%p273_p2), %v366_v36, %v365_v35  ;;  %v368_v41 = vld [vmem:[%s1937_s2 + $0x38] sm:$0xff] (!%p273_p2)  ;;  %v795_v43 = vld [vmem:[%s1939_s4] sm:$0xff] (!%p273_p2)  ;;  %v796_v44 = vld [vmem:[%s1939_s4 + $0x8] sm:$0xff] (!%p273_p2) }
   0xa   : > { %1577 = vmatprep.subr.bf16.mxu1 (!%p273_p2), %v1576_v19  ;;  %v1596_v42 = vpack.c.bf16 (!%p273_p2), %v368_v41, %v367_v40  ;;  %v1604_v45 = vpack.c.bf16 (!%p273_p2), %v796_v44, %v795_v43  ;;  %v797_v46 = vld [vmem:[%s1939_s4 + $0x10] sm:$0xff] (!%p273_p2)  ;;  %v798_v47 = vld [vmem:[%s1939_s4 + $0x18] sm:$0xff] (!%p273_p2)  ;;  %v799_v49 = vld [vmem:[%s1939_s4 + $0x20] sm:$0xff] (!%p273_p2) }
   0xb   : > { %v336_v8 = vsub.s32 (!%p273_p2), %v332_v6, %v334_v5  ;;  %vm343_vm0 = vcmp.eq.s32.totalorder (!%p273_p2), %v335_v7, 2  ;;  %vm337_vm3 = vcmp.eq.s32.totalorder (!%p273_p2), %v335_v7, 1  ;;  %v1608_v48 = vpack.c.bf16 (!%p273_p2), %v798_v47, %v797_v46  ;;  %v800_v50 = vld [vmem:[%s1939_s4 + $0x28] sm:$0xff] (!%p273_p2)  ;;  %v801_v52 = vld [vmem:[%s1939_s4 + $0x30] sm:$0xff] (!%p273_p2)  ;;  %v802_v53 = vld [vmem:[%s1939_s4 + $0x38] sm:$0xff] (!%p273_p2) }
   0xc   : > { %v1355_v10 = vsel (!%p273_p2), %vm343_vm0, 1.0, %v1688_v9  ;;  %v1751_v12 = vsel (!%p273_p2), %vm337_vm3, 1.0, %v1688_v9  ;;  %v1612_v51 = vpack.c.bf16 (!%p273_p2), %v800_v50, %v799_v49  ;;  %v1616_v54 = vpack.c.bf16 (!%p273_p2), %v802_v53, %v801_v52  ;;  %v1367_v55 = vld [vmem:[%s1938_s3] ss:$0 sm:$0xff] (!%p273_p2)  ;;  %v812_v0 = vld [vmem:[%s1939_s4 + $0x88] sm:$0xff] (!%p273_p2)  ;;  %v813_v4 = vld [vmem:[%s1939_s4 + $0x90] sm:$0xff] (!%p273_p2) }
   0xd   : > { %s1945_s28 = smov (!%p311_p3, %s1342_s28), 1  ;;  %vm344_vm2 = vcmp.eq.s32.totalorder %v336_v8, 2  ;;  %1454 = vmatprep.mubr.msk.f32.mxu0 %vm374_vm1, %v1355_v10  ;;  %vm338_vm4 = vcmp.eq.s32.totalorder %v336_v8, 1  ;;  %1579 = vmatpush3.bf16.msra.mxu1 %v1576_v19  ;;  %v811_v63 = vld [vmem:[%s1939_s4 + $0x80] sm:$0xff]  ;;  %v814_v5 = vld [vmem:[%s1939_s4 + $0x98] sm:$0xff]  ;;  %v816_v8 = vld [vmem:[%s1939_s4 + $0xa8] sm:$0xff] }
   0xe   : > { %s1742_s29 = sshll.u32 %s1945_s28, 4  ;;  %v1749_v11 = vsel %vm344_vm2, 1.0, %v1688_v9  ;;  %v1753_v13 = vsel %vm338_vm4, 1.0, %v1688_v9  ;;  %1581 = vmatprep.subr.bf16.mxu1 %v1580_v29  ;;  %v1620_v3 = vpack.c.bf16 %v812_v0, %v811_v63  ;;  %v1624_v6 = vpack.c.bf16 %v814_v5, %v813_v4  ;;  %v815_v7 = vld [vmem:[%s1939_s4 + $0xa0] sm:$0xff]  ;;  %v818_v14 = vld [vmem:[%s1939_s4 + $0xb8] sm:$0xff]  ;;  %v804_v16 = vld [vmem:[%s1939_s4 + $0x48] sm:$0xff] }
   0xf   : > { %s320_s10 = scalar_lea.vmem %s1936_s1, %s1742_s29  ;;  %s315_s21 = scalar_lea.vmem %s1935_s0, %s1742_s29  ;;  %v1628_v9 = vpack.c.bf16 %v816_v8, %v815_v7  ;;  %v805_v17 = vld [vmem:[%s1939_s4 + $0x50] sm:$0xff]  ;;  %v806_v19 = vld [vmem:[%s1939_s4 + $0x58] sm:$0xff]  ;;  %v1380_v63 = vld [vmem:[%s1942_s7] ss:$0 sm:$0xff] }
  0x10   : > { %v328_v1 = vld [vmem:[%s320_s10] sm:$0xff]  ;;  %v329_v2 = vld [vmem:[%s320_s10 + $0x8] sm:$0xff]  ;;  %v809_v30 = vld [vmem:[%s1939_s4 + $0x70] sm:$0xff]  ;;  %s325_s16 = scalar_lea.vmem %s1943_s8, %s1742_s29 }
  0x11   : > { %351 = vperm.xlu0 %1674, %v328_v1   ;;  %v1773_v21 = vld [vmem:[%s315_s21] sm:$0xff]  ;;  %v1775_v22 = vld [vmem:[%s315_s21 + $0x8] sm:$0xff]  ;;  %v810_v31 = vld [vmem:[%s1939_s4 + $0x78] sm:$0xff] }
  0x15   : > { %356 = vperm.xlu0 %1674, %v329_v2  }
  0x90   : > { %v1771_v20 = vpop.permute.xlu0 %351 }
  0x91   : > { %v359_v24 = vmul.f32 %v1771_v20, %v1773_v21 }
  0x94   : > { %v1777_v23 = vpop.permute.xlu0 %356 }
  0x95   : > { %v360_v25 = vmul.f32 %v1777_v23, %v1775_v22 }
  0x97   : > { %v1568_v26 = vpack.c.bf16 %v360_v25, %v359_v24 }
  0x99   : > { %1569 = vmatprep.subr.bf16.mxu0 %v1568_v26 }
  0x9a   : > { %1571 = vmatpush3.bf16.msra.mxu0 %v1568_v26 }
  0x9b   : > { %1589 = vmatprep.subr.bf16.mxu0 %v1568_v26 }
  0x9d   : > { %1455 = vmatmul.mubr.msk.f32.vlgmr.msra.gmra.mrb[0].mxu0 %vm374_vm1, %v1749_v11 }
  0x9e   : > { %1591 = vmatpush3.bf16.msra.mxu0 %v1568_v26  ;;  %1483 = vmatprep.mubr.msk.f32.mxu0 %vm374_vm1, %v1751_v12  ;;  %v808_v26 = vld [vmem:[%s1939_s4 + $0x68] sm:$0xff] }
  0xa1   : > { %1484 = vmatmul.mubr.msk.f32.vlgmr.msra.gmra.mrb[2].mxu0 %vm374_vm1, %v1753_v13 }
  0xa2   : > { %1501 = vmatprep.mubr.msk.f32.mxu0 %vm374_vm1, %v1355_v10  ;;  %v817_v10 = vld [vmem:[%s1939_s4 + $0xb0] sm:$0xff] }
  0xa3   : > { %v1632_v15 = vpack.c.bf16 %v818_v14, %v817_v10 }
 0x170   : > { %v1456_v32 = vpop.f32.mrb[0].mxu0 }
 0x171   : > { %v447_v33 = vpop.f32.mrb[1].mxu0 }
 0x172   : > { %1465 = vmatprep.mubr.msk.f32.mxu1 %vm456_vm5, %v447_v33 }
 0x173   : > { %1466 = vmatmul.mubr.msk.f32.vlgmr.msra.gmra.mrb[0].mxu1 %vm456_vm5, %v1456_v32  ;;  %v1652_v32 = vpack.c.bf16 %v810_v31, %v809_v30 }
 0x174   : > { %1583 = vmatpush3.bf16.msra.mxu1 %v1580_v29  ;;  %1476 = vmatprep.mubr.msk.f32.mxu1 %vm456_vm5, %v359_v24  ;;  %v1485_v37 = vpop.f32.mrb[2].mxu0  ;;  %v1644_v24 = vpack.c.bf16 %v806_v19, %v805_v17 }
 0x175   : > { %1585 = vmatprep.subr.bf16.mxu1 %v1584_v34  ;;  %v691_v39 = vpop.f32.mrb[3].mxu0 }
 0x178   : > { %1587 = vmatpush3.bf16.msra.mxu1 %v1584_v34 }
 0x179   : > { %1593 = vmatprep.subr.bf16.mxu1 %v1592_v38 }
 0x17b   : > { %1477 = vmatmul.mubr.msk.f32.vlgmr.msra.gmra.mrb[0].mxu1 %vm456_vm5, %v360_v25  ;;  %v807_v25 = vld [vmem:[%s1939_s4 + $0x60] sm:$0xff] }
 0x17c   : > { %1595 = vmatpush3.bf16.msra.mxu1 %v1592_v38  ;;  %1494 = vmatprep.mubr.msk.f32.mxu1 %vm456_vm5, %v691_v39  ;;  %v1648_v27 = vpack.c.bf16 %v808_v26, %v807_v25 }
 0x17d   : > { %1597 = vmatprep.subr.bf16.mxu1 %v1596_v42 }
 0x180   : > { %1599 = vmatpush3.bf16.msra.mxu1 %v1596_v42 }
 0x181   : > { %1605 = vmatprep.subr.bf16.mxu1 %v1604_v45 }
 0x183   : > { %1495 = vmatmul.mubr.msk.f32.vlgmr.msra.gmra.mrb[0].mxu1 %vm456_vm5, %v1485_v37 }
 0x184   : > { %1607 = vmatpush3.bf16.msra.mxu1 %v1604_v45 }
 0x185   : > { %1609 = vmatprep.subr.bf16.mxu1 %v1608_v48 }
 0x188   : > { %1611 = vmatpush3.bf16.msra.mxu1 %v1608_v48 }
 0x189   : > { %1613 = vmatprep.subr.bf16.mxu1 %v1612_v51 }
 0x18c   : > { %1615 = vmatpush3.bf16.msra.mxu1 %v1612_v51 }
 0x18d   : > { %1617 = vmatprep.subr.bf16.mxu1 %v1616_v54 }
 0x190   : > { %1619 = vmatpush3.bf16.msra.mxu1 %v1616_v54 }
 0x256   : > { %v1496_v56 = vpop.f32.mrb[0].mxu1 }
 0x257   : > { %v790_v57 = vadd.f32 %v1496_v56, %v1367_v55  ;;  %v772_v58 = vpop.f32.mrb[1].mxu1 }
 0x258   : > { %v789_v59 = vadd.f32 %v1367_v55, %v772_v58 }
 0x259   : > { %v792_v60 = vmax.f32 %v790_v57, 0.0 }
 0x25a   : > { %v791_v61 = vmax.f32 %v789_v59, 0.0 }
 0x25b   : > { %v794_v62 = vmul.f32 %v792_v60, %v1777_v23 }
 0x25c   : > { %v793_v1 = vmul.f32 %v791_v61, %v1771_v20  ;;  %v1379_v61 = vld [vmem:[%s1941_s6] ss:$0 sm:$0xff] }
 0x25e   : > { %v1600_v2 = vpack.c.bf16 %v794_v62, %v793_v1 }
 0x260   : > { %1601 = vmatprep.subr.bf16.mxu0 %v1600_v2  ;;  %1637 = vmatprep.subr.bf16.mxu1 %v1600_v2 }
 0x261   : > { %1603 = vmatpush3.bf16.msra.mxu0 %v1600_v2 }
 0x262   : > { %1621 = vmatprep.subr.bf16.mxu0 %v1620_v3 }
 0x264   : > { %1502 = vmatmul.mubr.msk.f32.vlgmr.msra.gmra.mrb[4].mxu0 %vm374_vm1, %v1749_v11  ;;  %v803_v11 = vld [vmem:[%s1939_s4 + $0x40] sm:$0xff] }
 0x265   : > { %1623 = vmatpush3.bf16.msra.mxu0 %v1620_v3  ;;  %1539 = vmatprep.mubr.msk.f32.mxu0 %vm895_vm6, %v793_v1  ;;  %v1640_v18 = vpack.c.bf16 %v804_v16, %v803_v11 }
 0x266   : > { %1625 = vmatprep.subr.bf16.mxu0 %v1624_v6 }
 0x269   : > { %1627 = vmatpush3.bf16.msra.mxu0 %v1624_v6 }
 0x26a   : > { %1629 = vmatprep.subr.bf16.mxu0 %v1628_v9 }
 0x26d   : > { %1631 = vmatpush3.bf16.msra.mxu0 %v1628_v9 }
 0x26e   : > { %1633 = vmatprep.subr.bf16.mxu0 %v1632_v15 }
 0x271   : > { %1635 = vmatpush3.bf16.msra.mxu0 %v1632_v15 }
 0x272   : > { %1641 = vmatprep.subr.bf16.mxu0 %v1640_v18 }
 0x274   : > { %1540 = vmatmul.mubr.msk.f32.vlgmr.msra.gmra.mrb[6].mxu0 %vm895_vm6, %v794_v62 }
 0x275   : > { %1643 = vmatpush3.bf16.msra.mxu0 %v1640_v18 }
 0x276   : > { %1645 = vmatprep.subr.bf16.mxu0 %v1644_v24 }
 0x279   : > { %1647 = vmatpush3.bf16.msra.mxu0 %v1644_v24 }
 0x27a   : > { %1649 = vmatprep.subr.bf16.mxu0 %v1648_v27 }
 0x27d   : > { %1651 = vmatpush3.bf16.msra.mxu0 %v1648_v27 }
 0x27e   : > { %1653 = vmatprep.subr.bf16.mxu0 %v1652_v32 }
 0x281   : > { %1655 = vmatpush3.bf16.msra.mxu0 %v1652_v32 }
 0x337   : > { %v1503_v28 = vpop.f32.mrb[4].mxu0 }
 0x338   : > { %v886_v29 = vpop.f32.mrb[5].mxu0 }
 0x339   : > { %1520 = vmatprep.mubr.msk.f32.mxu1 %vm895_vm6, %v886_v29 }
 0x33a   : > { %1521 = vmatmul.mubr.msk.f32.vlgmr.msra.gmra.mrb[2].mxu1 %vm895_vm6, %v1503_v28 }
 0x33b   : > { %1639 = vmatpush3.bf16.msra.mxu1 %v1600_v2  ;;  %1546 = vmatprep.mubr.msk.f32.mxu1 %vm374_vm1, %v1751_v12  ;;  %v1378_v12 = vld [vmem:[%s1940_s5] ss:$0 sm:$0xff] }
 0x33e   : > { %1547 = vmatmul.mubr.msk.f32.vlgmr.msra.gmra.mrb[4].mxu1 %vm374_vm1, %v1753_v13 }
 0x40d   : > { %v1522_v33 = vpop.f32.mrb[2].mxu1 }
 0x40e   : > { %v968_v34 = vpop.f32.mrb[3].mxu1 }
 0x411   : > { %v1548_v35 = vpop.f32.mrb[4].mxu1 }
 0x412   : > { %v1124_v36 = vpop.f32.mrb[5].mxu1 }
 0x413   : > { %1565 = vmatprep.mubr.msk.f32.mxu0 %vm895_vm6, %v1124_v36 }
 0x414   : > { %1566 = vmatmul.mubr.msk.f32.vlgmr.msra.gmra.mrb[6].mxu0 %vm895_vm6, %v1548_v35 }
 0x4e7   : > { %v1567_v13 = vpop.f32.mrb[6].mxu0 }
 0x4e8   : > { %v1656_v37 = vadd.f32 %v1567_v13, %v1522_v33  ;;  %v1205_v38 = vpop.f32.mrb[7].mxu0 }
 0x4e9   : > { %v1657_v39 = vadd.f32 %v1205_v38, %v968_v34 }
 0x4ea   : > { %v1223_v40 = vadd.f32 %v1656_v37, %v1378_v12 }
 0x4eb   : > { %v1222_v41 = vadd.f32 %v1657_v39, %v1378_v12 }
 0x4ec   : > { %v1225_v43 = vmul.f32 %v1223_v40, %v1777_v23 }
 0x4ed   : > { %v1224_v42 = vmul.f32 %v1222_v41, %v1771_v20 }
 0x4ee   : > { %v1227_v46 = vadd.f32 %v1225_v43, %v1775_v22 }
 0x4ef   : > { %v1226_v44 = vadd.f32 %v1224_v42, %v1773_v21 }
 0x4f0   : > { %v1233_v47 = vsel %vm456_vm5, %v1227_v46, 0.0 }
 0x4f1   : > { %v1230_v45 = vsel %vm456_vm5, %v1226_v44, 0.0 }
 0x4f2   : > { %1231 = vadd.xlane.f32.xlu1 %v1230_v45 }
 0x4f6   : > { %1234 = vadd.xlane.f32.xlu1 %v1233_v47 }
 0x57f   : > { %v1232_v48 = vpop.xlane.xlu1 %1231 }
 0x580   : > { %v1237_v49 = vmul.f32 0.03125, %v1232_v48 }
 0x582   : > { %v1239_v50 = vsub.f32 %v1226_v44, %v1237_v49 }
 0x583   : > { %v1235_v51 = vpop.xlane.xlu1 %1234 }
 0x584   : > { %v1238_v52 = vmul.f32 0.03125, %v1235_v51  ;;  %v1241_v53 = vmul.f32 %v1239_v50, %v1239_v50 }
 0x586   : > { %v1240_v54 = vsub.f32 %v1227_v46, %v1238_v52  ;;  %v1243_v20 = vsel %vm456_vm5, %v1241_v53, 0.0 }
 0x587   : > { %1244 = vadd.xlane.f32.xlu0 %v1243_v20 }
 0x588   : > { %v1242_v23 = vmul.f32 %v1240_v54, %v1240_v54 }
 0x58a   : > { %v1246_v21 = vsel %vm456_vm5, %v1242_v23, 0.0 }
 0x58b   : > { %1247 = vadd.xlane.f32.xlu1 %v1246_v21 }
 0x614   : > { %v1245_v22 = vpop.xlane.xlu0 %1244 }
 0x615   : > { %v1249_v55 = vmul.f32 0.03125, %v1245_v22 }
 0x617   : > { %v1251_v56 = vadd.f32 1e-05, %v1249_v55 }
 0x618   : > { %v1248_v57 = vpop.xlane.xlu1 %1247 }
 0x619   : > { %1675 = vrsqrt.f32 %v1251_v56  ;;  %v1250_v58 = vmul.f32 0.03125, %v1248_v57 }
 0x61b   : > { %v1252_v59 = vadd.f32 1e-05, %v1250_v58 }
 0x61d   : > { %1677 = vrsqrt.f32 %v1252_v59 }
 0x623   : > { %v1676_v60 = vpop.eup %1675 }
 0x624   : > { %v1255_v62 = vmul.f32 %v1676_v60, %v1239_v50 }
 0x626   : > { %v1263_v0 = vmul.f32 %v1379_v61, %v1255_v62 }
 0x627   : > { %v1678_v1 = vpop.eup %1677 }
 0x628   : > { %v1271_v2 = vadd.f32 %v1380_v63, %v1263_v0  ;;  %v1256_v3 = vmul.f32 %v1678_v1, %v1240_v54 }
 0x62a   : > { %1273 = vst.msk [vmem:[%s325_s16] sm:$0xff] %vm456_vm5, %v1271_v2  ;;  %v1264_v4 = vmul.f32 %v1379_v61, %v1256_v3 }
 0x62c   : > { %v1272_v5 = vadd.f32 %v1380_v63, %v1264_v4 }
 0x62e   : > { %1274 = vst.msk [vmem:[%s325_s16 + $0x8] sm:$0xff] %vm456_vm5, %v1272_v5 }
 0x62f PF: > { %s18_s27 = sadd.s32 1, %s1685_s27  }
 0x630   : > { %p15_p4 = scmp.ge.s32.totalorder %s18_s27, 4  }
 0x632   :  { %17 = sbr.rel (!%p15_p4) target bundleno = 1 (0x1), region = 85 }

// kernel: decoder_forward.6
= control target key start
LH: loop header
LB: loop body
LE: loop exit
PB: predicated region body
PF: predicated region fallthrough
CT: control target
= control target key end

     0   :  { %s2053_s27 = smov 0   ;;  %s2237_s0 = inlined_call_operand.vmem [shape: f32[2,16,32], index: 0, kind: input, shape index: {}]   ;;  %s2238_s1 = inlined_call_operand.vmem [shape: f32[16,16], index: 1, kind: input, shape index: {}]   ;;  %s2239_s2 = inlined_call_operand.vmem [shape: f32[32,96], index: 2, kind: input, shape index: {}]   ;;  %s2240_s3 = inlined_call_operand.vmem [shape: f32[1,96], index: 3, kind: input, shape index: {}]   ;;  %s2241_s4 = inlined_call_operand.vmem [shape: f32[32,32], index: 4, kind: input, shape index: {}]   ;;  %s2242_s5 = inlined_call_operand.vmem [shape: f32[1,32], index: 5, kind: input, shape index: {}]   ;;  %s2243_s6 = inlined_call_operand.vmem [shape: f32[1,32], index: 6, kind: input, shape index: {}]   ;;  %s2244_s7 = inlined_call_operand.vmem [shape: f32[1,32], index: 7, kind: input, shape index: {}]   ;;  %s2245_s8 = inlined_call_operand.vmem [shape: f32[2,16,32], index: 8, kind: output, shape index: {}]  }
   0x1 LB: > { %s1652_s28 = sadd.s32 4294967295, %s1995_s27   ;;  %p1656_p0 = scmp.ge.s32.totalorder %s1995_s27, 1  ;;  %s1995_s27 = sphi %s2053_s27, %s18_s27  }
   0x2   : > { %p262_p1 = scmp.lt.s32.totalorder %s1995_s27, 3 }
   0x4   : > { %p263_p2 = pnand %p1656_p0, %p262_p1 }
   0x5   : > { %v308_v0 = vld [vmem:[%s2239_s2] sm:$0xff] (!%p263_p2)  ;;  %v309_v1 = vld [vmem:[%s2239_s2 + $0x8] sm:$0xff] (!%p263_p2)  ;;  %v310_v2 = vld [vmem:[%s2239_s2 + $0x10] sm:$0xff] (!%p263_p2)  ;;  %p296_p3 = scmp.lt.s32.totalorder (!%p263_p2), %s1652_s28, 1  ;;  %vm319_vm0 = vcmask (!%p263_p2), 261120   ;;  %vm416_vm1 = vcmask (!%p263_p2), 64512  }
   0x6   : > { %266 = sbr.rel (%p263_p2) target bundleno = 2716 (0xa9c), region = 52  ;;  %v1840_v3 = vpack.c.bf16 (!%p263_p2), %v309_v1, %v308_v0  ;;  %v311_v4 = vld [vmem:[%s2239_s2 + $0x18] sm:$0xff] (!%p263_p2)  ;;  %v1661_v8 = vld [vmem:[%s2240_s3] ss:$0 sm:$0xff] (!%p263_p2)  ;;  %s1997_s21 = smov (!%p263_p2), 96   ;;  %vm2101_vm2 = vmpackc.low (!%p263_p2), %vm416_vm1, %vm416_vm1  ;;  %vm502_vm3 = vcmask (!%p263_p2), 130048  }
   0x7   : > { %v1844_v5 = vpack.c.bf16 (!%p263_p2), %v311_v4, %v310_v2  ;;  %v2116_v21 = vld [vmem:[%s2238_s1 + $0x8] sm:$0xff] (!%p263_p2)  ;;  %v2121_v22 = vld [vmem:[%s2238_s1] sm:$0xff] (!%p263_p2)  ;;  %s1998_s26 = smov (!%p263_p2), 64   ;;  %s1999_s29 = smov (!%p263_p2), 88  }
   0x8   : > { %1841 = vmatprep.subr.bf16.mxu0 (!%p263_p2), %v1840_v3  ;;  %s2000_s30 = smov (!%p263_p2), 120   ;;  %s2001_s9 = smov (!%p263_p2), 80  }
   0x9   : > { %1843 = vmatpush3.bf16.msra.mxu0 (!%p263_p2), %v1840_v3  ;;  %s2002_s10 = smov (!%p263_p2), 112   ;;  %s2003_s11 = smov (!%p263_p2), 56  }
   0xa   : > { %1845 = vmatprep.subr.bf16.mxu0 (!%p263_p2), %v1844_v5  ;;  %s2004_s12 = smov (!%p263_p2), 72   ;;  %s2005_s13 = smov (!%p263_p2), 104  }
   0xb   : > { %s2006_s14 = smov (!%p263_p2), 48   ;;  %s2007_s16 = smov (!%p263_p2), 40  }
   0xd   : > { %s2249_s28 = smov (!%p296_p3, %s1652_s28), 1  ;;  %1847 = vmatpush3.bf16.msra.mxu0 %v1844_v5 }
   0xe   : > { %s1701_s15 = sshll.u32 %s2249_s28, 4 }
   0xf   : > { %s300_s18 = scalar_lea.vmem %s2237_s0, %s1701_s15 }
  0x10   : > { %v2081_v6 = vld [vmem:[%s300_s18] sm:$0xff]  ;;  %v2085_v7 = vld [vmem:[%s300_s18 + $0x8] sm:$0xff] }
  0x11   : > { %1761 = vmatprep.mubr.msk.f32.mxu0 %vm319_vm0, %v2081_v6 }
  0x12   : > { %1762 = vmatmul.mubr.msk.f32.vlgmr.msra.gmra.mrb[0].mxu0 %vm319_vm0, %v2085_v7 }
  0xe5   : > { %v1763_v9 = vpop.f32.mrb[0].mxu0 }
  0xe6   : > { %v398_v10 = vadd.f32 %v1763_v9, %v1661_v8  ;;  %v392_v11 = vpop.f32.mrb[1].mxu0 }
  0xe7   : > { %v393_v12 = vadd.f32 %v1661_v8, %v392_v11 }
  0xe8   : > { %v2109_v20 = vmul.f32 0.35355338, %v398_v10 }
  0xe9   : > { %v2092_v13 = vpack.i.bf16 %v398_v10, %v393_v12  ;;  %v2094_v14 = vmul.f32 0.35355338, %v393_v12 }
  0xeb   : > { %1914 = vrot.lane.b32.xlu0 %v2092_v13, %s1997_s21  ;;  %1768 = vmatprep.mubr.msk.f32.mxu1 %vm416_vm1, %v2094_v14 }
 0x15d   : > { %v1915_v15 = vpop.permute.xlu0 %1914 }
 0x15e   : > { %v1917_v16 = vunpack.i.h.bf16 %v1915_v15  ;;  %v1916_v17 = vunpack.i.l.bf16 %v1915_v15 }
 0x160   : > { %v1848_v19 = vpack.c.bf16 %v1917_v16, %v1916_v17 }
 0x162   : > { %1850 = vmatprep.subr.msk.bf16.mxu1 %vm2101_vm2, %v1848_v19 }
 0x163   : > { %1853 = vmatpush3.bf16.xpose.msk.msra.mxu1 %vm2101_vm2, %v1848_v19 }
 0x16a   : > { %1769 = vmatmul.mubr.msk.f32.vlgmr.msra.gmra.mrb[0].mxu1 %vm416_vm1, %v2109_v20 }
 0x23d   : > { %v1770_v23 = vpop.f32.mrb[0].mxu1 }
 0x23e   : > { %v499_v24 = vadd.f32 %v1770_v23, %v2116_v21  ;;  %v493_v25 = vpop.f32.mrb[1].mxu1 }
 0x23f   : > { %v494_v26 = vadd.f32 %v493_v25, %v2121_v22 }
 0x240   : > { %v506_v27 = vsel %vm502_vm3, %v499_v24, -inf }
 0x241   : > { %507 = vmax.xlane.f32.xlu1 %v506_v27  ;;  %v503_v28 = vsel %vm502_vm3, %v494_v26, -inf }
 0x242   : > { %504 = vmax.xlane.f32.xlu0 %v503_v28 }
 0x252   : > { %1919 = vrot.lane.b32.xlu1 %v2092_v13, %s1998_s26 }
 0x256   : > { %1924 = vrot.lane.b32.xlu1 %v2092_v13, %s1999_s29 }
 0x258   : > { %614 = vrot.lane.b32.xlu0 %v2109_v20, %s2000_s30 }
 0x2ce   : > { %v508_v29 = vpop.xlane.xlu1 %507 }
 0x2cf   : > { %v510_v30 = vsub.f32 %v499_v24, %v508_v29  ;;  %v505_v31 = vpop.xlane.xlu0 %504 }
 0x2d0   : > { %v509_v32 = vsub.f32 %v494_v26, %v505_v31 }
 0x2d1   : > { %v513_v33 = vmul.f32 1.442695, %v510_v30 }
 0x2d2   : > { %v511_v34 = vmul.f32 1.442695, %v509_v32  ;;  %v1920_v35 = vpop.permute.xlu1 %1919 }
 0x2d3   : > { %1953 = vpow2.f32 %v513_v33  ;;  %v1922_v36 = vunpack.i.h.bf16 %v1920_v35  ;;  %v1921_v37 = vunpack.i.l.bf16 %v1920_v35  ;;  %v615_v58 = vpop.permute.xlu0 %614 }
 0x2d4   : > { %1955 = vpow2.f32 %v511_v34 }
 0x2d5   : > { %v1854_v38 = vpack.c.bf16 %v1922_v36, %v1921_v37 }
 0x2d6   : > { %v1925_v39 = vpop.permute.xlu1 %1924 }
 0x2d7   : > { %v1927_v40 = vunpack.i.h.bf16 %v1925_v39  ;;  %v1926_v41 = vunpack.i.l.bf16 %v1925_v39  ;;  %1855 = vmatprep.subr.bf16.mxu1 %v1854_v38 }
 0x2d8   : > { %1857 = vmatpush3.bf16.msra.mxu1 %v1854_v38 }
 0x2d9   : > { %v1858_v42 = vpack.c.bf16 %v1927_v40, %v1926_v41 }
 0x2db   : > { %1860 = vmatprep.subr.msk.bf16.mxu1 %vm2101_vm2, %v1858_v42 }
 0x2dd   : > { %v1954_v43 = vpop.eup %1953 }
 0x2de   : > { %v518_v44 = vsel %vm502_vm3, %v1954_v43, 0.0  ;;  %v1956_v45 = vpop.eup %1955 }
 0x2df   : > { %519 = vadd.xlane.f32.xlu1 %v518_v44  ;;  %v515_v46 = vsel %vm502_vm3, %v1956_v45, 0.0 }
 0x2e3   : > { %516 = vadd.xlane.f32.xlu1 %v515_v46 }
 0x2f4   : > { %612 = vrot.lane.b32.xlu1 %v2094_v14, %s2000_s30 }
 0x2f8   : > { %1929 = vrot.lane.b32.xlu1 %v2092_v13, %s2001_s9 }
 0x2fc   : > { %974 = vrot.lane.b32.xlu1 %v2094_v14, %s2002_s10 }
 0x300   : > { %976 = vrot.lane.b32.xlu1 %v2109_v20, %s2002_s10 }
 0x36c   : > { %v520_v47 = vpop.xlane.xlu1 %519 }
 0x36d   : > { %1957 = vrcp.f32 %v520_v47 }
 0x370   : > { %v517_v48 = vpop.xlane.xlu1 %516 }
 0x371   : > { %1959 = vrcp.f32 %v517_v48 }
 0x374   : > { %v613_v49 = vpop.permute.xlu1 %612 }
 0x377   : > { %v1958_v51 = vpop.eup %1957 }
 0x378   : > { %v1930_v50 = vpop.permute.xlu1 %1929  ;;  %v524_v56 = vmul.f32 %v1958_v51, %v1954_v43  ;;  %v404_v51 = vld [vmem:[%s2241_s4 + $0x8] sm:$0xff] }
 0x379   : > { %v1932_v53 = vunpack.i.h.bf16 %v1930_v50  ;;  %v1931_v54 = vunpack.i.l.bf16 %v1930_v50 }
 0x37b   : > { %v1960_v52 = vpop.eup %1959  ;;  %v1868_v57 = vpack.c.bf16 %v1932_v53, %v1931_v54 }
 0x37c   : > { %v523_v55 = vmul.f32 %v1960_v52, %v1956_v45  ;;  %v975_v59 = vpop.permute.xlu1 %974  ;;  %v403_v52 = vld [vmem:[%s2241_s4] sm:$0xff] }
 0x37e   : > { %1775 = vmatprep.mubr.msk.f32.mxu1 %vm502_vm3, %v523_v55 }
 0x37f   : > { %1776 = vmatmul.mubr.msk.f32.vlgmr.msra.gmra.mrb[2].mxu1 %vm502_vm3, %v524_v56 }
 0x380   : > { %1863 = vmatpush3.bf16.xpose.msk.msra.mxu1 %vm2101_vm2, %v1858_v42  ;;  %1782 = vmatprep.mubr.msk.f32.mxu1 %vm416_vm1, %v613_v49  ;;  %v977_v60 = vpop.permute.xlu1 %976 }
 0x381   : > { %1870 = vmatprep.subr.msk.bf16.mxu1 %vm2101_vm2, %v1868_v57 }
 0x387   : > { %1783 = vmatmul.mubr.msk.f32.vlgmr.msra.gmra.mrb[4].mxu1 %vm416_vm1, %v615_v58 }
 0x388   : > { %1873 = vmatpush3.bf16.xpose.msk.msra.mxu1 %vm2101_vm2, %v1868_v57  ;;  %1806 = vmatprep.mubr.msk.f32.mxu1 %vm416_vm1, %v975_v59 }
 0x38f   : > { %1807 = vmatmul.mubr.msk.f32.vlgmr.msra.gmra.mrb[6].mxu1 %vm416_vm1, %v977_v60 }
 0x452   : > { %v2150_v61 = vpop.f32.mrb[2].mxu1 }
 0x453   : > { %v2152_v62 = vpop.f32.mrb[3].mxu1 }
 0x45a   : > { %v1784_v63 = vpop.f32.mrb[4].mxu1 }
 0x45b   : > { %v700_v0 = vadd.f32 %v1784_v63, %v2116_v21  ;;  %v694_v1 = vpop.f32.mrb[5].mxu1 }
 0x45c   : > { %v695_v2 = vadd.f32 %v694_v1, %v2121_v22 }
 0x45d   : > { %v706_v3 = vsel %vm502_vm3, %v700_v0, -inf }
 0x45e   : > { %707 = vmax.xlane.f32.xlu0 %v706_v3  ;;  %v703_v4 = vsel %vm502_vm3, %v695_v2, -inf }
 0x45f   : > { %704 = vmax.xlane.f32.xlu1 %v703_v4 }
 0x462   : > { %v1808_v5 = vpop.f32.mrb[6].mxu1 }
 0x463   : > { %v1056_v8 = vpop.f32.mrb[7].mxu1  ;;  %v1062_v27 = vadd.f32 %v1808_v5, %v2116_v21 }
 0x464   : > { %v1057_v25 = vadd.f32 %v1056_v8, %v2121_v22 }
 0x465   : > { %v1068_v28 = vsel %vm502_vm3, %v1062_v27, -inf }
 0x466   : > { %v1065_v26 = vsel %vm502_vm3, %v1057_v25, -inf }
 0x4eb   : > { %v708_v9 = vpop.xlane.xlu0 %707 }
 0x4ec   : > { %v710_v10 = vsub.f32 %v700_v0, %v708_v9  ;;  %v705_v11 = vpop.xlane.xlu1 %704 }
 0x4ed   : > { %v709_v12 = vsub.f32 %v695_v2, %v705_v11 }
 0x4ee   : > { %v713_v15 = vmul.f32 1.442695, %v710_v10 }
 0x4ef   : > { %v711_v16 = vmul.f32 1.442695, %v709_v12 }
 0x4f0   : > { %1961 = vpow2.f32 %v713_v15 }
 0x4f1   : > { %1963 = vpow2.f32 %v711_v16 }
 0x4fa   : > { %v1962_v17 = vpop.eup %1961 }
 0x4fb   : > { %v1964_v19 = vpop.eup %1963  ;;  %v718_v23 = vsel %vm502_vm3, %v1962_v17, 0.0 }
 0x4fc   : > { %719 = vadd.xlane.f32.xlu0 %v718_v23  ;;  %v715_v24 = vsel %vm502_vm3, %v1964_v19, 0.0 }
 0x4fd   : > { %716 = vadd.xlane.f32.xlu1 %v715_v24 }
 0x50e   : > { %1934 = vrot.lane.b32.xlu1 %v2092_v13, %s2003_s11 }
 0x512   : > { %1939 = vrot.lane.b32.xlu0 %v2092_v13, %s2004_s12  ;;  %1257 = vrot.lane.b32.xlu1 %v2094_v14, %s2005_s13 }
 0x516   : > { %1259 = vrot.lane.b32.xlu1 %v2109_v20, %s2005_s13  ;;  %s305_s13 = scalar_lea.vmem %s2245_s8, %s1701_s15 }
 0x531   : > { %1066 = vmax.xlane.f32.xlu0 %v1065_v26 }
 0x53a   : > { %1069 = vmax.xlane.f32.xlu1 %v1068_v28 }
 0x54b   : > { %1944 = vrot.lane.b32.xlu1 %v2092_v13, %s2006_s14 }
 0x54f   : > { %1949 = vrot.lane.b32.xlu1 %v2092_v13, %s2007_s16 }
 0x589   : > { %v720_v29 = vpop.xlane.xlu0 %719 }
 0x58a   : > { %1965 = vrcp.f32 %v720_v29  ;;  %v717_v14 = vpop.xlane.xlu1 %716 }
 0x58b   : > { %1967 = vrcp.f32 %v717_v14  ;;  %v406_v14 = vld [vmem:[%s2241_s4 + $0x18] sm:$0xff] }
 0x58d   : > { %v1940_v20 = vpop.permute.xlu0 %1939 }
 0x58e   : > { %v1942_v30 = vunpack.i.h.bf16 %v1940_v20  ;;  %v1941_v31 = vunpack.i.l.bf16 %v1940_v20  ;;  %v1935_v32 = vpop.permute.xlu1 %1934 }
 0x58f   : > { %v1937_v33 = vunpack.i.h.bf16 %v1935_v32  ;;  %v1936_v34 = vunpack.i.l.bf16 %v1935_v32 }
 0x590   : > { %v1878_v35 = vpack.c.bf16 %v1942_v30, %v1941_v31 }
 0x591   : > { %v1864_v36 = vpack.c.bf16 %v1937_v33, %v1936_v34 }
 0x592   : > { %1880 = vmatprep.subr.msk.bf16.mxu1 %vm2101_vm2, %v1878_v35  ;;  %v1258_v37 = vpop.permute.xlu1 %1257 }
 0x593   : > { %1865 = vmatprep.subr.bf16.mxu0 %v1864_v36  ;;  %1883 = vmatpush3.bf16.xpose.msk.msra.mxu1 %vm2101_vm2, %v1878_v35 }
 0x594   : > { %v1966_v13 = vpop.eup %1965  ;;  %1825 = vmatprep.mubr.msk.f32.mxu1 %vm416_vm1, %v1258_v37  ;;  %1867 = vmatpush3.bf16.msra.mxu0 %v1864_v36  ;;  %v1696_v37 = vld [vmem:[%s2242_s5] ss:$0 sm:$0xff] }
 0x595   : > { %v1968_v38 = vpop.eup %1967  ;;  %v724_v40 = vmul.f32 %v1966_v13, %v1962_v17  ;;  %1792 = vmatprep.subr.mxu0 %v404_v51 }
 0x596   : > { %v723_v39 = vmul.f32 %v1968_v38, %v1964_v19  ;;  %v1260_v41 = vpop.permute.xlu1 %1259 }
 0x598   : > { %1789 = vmatprep.mubr.msk.f32.mxu0 %vm502_vm3, %v723_v39 }
 0x599   : > { %1790 = vmatmul.mubr.msk.f32.vlgmr.msra.gmra.mrb[2].mxu0 %vm502_vm3, %v724_v40 }
 0x59a   : > { %1826 = vmatmul.mubr.msk.f32.vlgmr.msra.gmra.mrb[8].mxu1 %vm416_vm1, %v1260_v41  ;;  %1793 = vmatpush3.msra.mxu0 %v404_v51 }
 0x59b   : > { %1797 = vmatprep.subr.mxu0 %v403_v52 }
 0x5be   : > { %v1067_v42 = vpop.xlane.xlu0 %1066 }
 0x5bf   : > { %v1071_v43 = vsub.f32 %v1057_v25, %v1067_v42 }
 0x5c1   : > { %v1073_v44 = vmul.f32 1.442695, %v1071_v43 }
 0x5c3   : > { %1969 = vpow2.f32 %v1073_v44 }
 0x5c7   : > { %v1070_v18 = vpop.xlane.xlu1 %1069 }
 0x5c8   : > { %v1072_v45 = vsub.f32 %v1062_v27, %v1070_v18 }
 0x5ca   : > { %v1075_v46 = vmul.f32 1.442695, %v1072_v45 }
 0x5cb   : > { %v1945_v54 = vpop.permute.xlu1 %1944 }
 0x5cc   : > { %1971 = vpow2.f32 %v1075_v46  ;;  %v1947_v56 = vunpack.i.h.bf16 %v1945_v54  ;;  %v1946_v57 = vunpack.i.l.bf16 %v1945_v54 }
 0x5cd   : > { %v1970_v47 = vpop.eup %1969 }
 0x5ce   : > { %v1077_v48 = vsel %vm502_vm3, %v1970_v47, 0.0  ;;  %v1874_v0 = vpack.c.bf16 %v1947_v56, %v1946_v57 }
 0x5cf   : > { %1078 = vadd.xlane.f32.xlu0 %v1077_v48  ;;  %v1950_v5 = vpop.permute.xlu1 %1949 }
 0x5d0   : > { %v1952_v11 = vunpack.i.h.bf16 %v1950_v5  ;;  %v1951_v12 = vunpack.i.l.bf16 %v1950_v5 }
 0x5d6   : > { %v1972_v49 = vpop.eup %1971 }
 0x5d7   : > { %v1080_v50 = vsel %vm502_vm3, %v1972_v49, 0.0 }
 0x5d8   : > { %1081 = vadd.xlane.f32.xlu0 %v1080_v50 }
 0x65c   : > { %v1079_v53 = vpop.xlane.xlu0 %1078 }
 0x65d   : > { %1973 = vrcp.f32 %v1079_v53 }
 0x665   : > { %v1082_v55 = vpop.xlane.xlu0 %1081 }
 0x666   : > { %1975 = vrcp.f32 %v1082_v55 }
 0x667   : > { %v1974_v4 = vpop.eup %1973 }
 0x668   : > { %v1085_v10 = vmul.f32 %v1974_v4, %v1970_v47 }
 0x66c   : > { %v1791_v58 = vpop.f32.mrb[2].mxu0 }
 0x66d   : > { %v803_v59 = vpop.f32.mrb[3].mxu0  ;;  %v1827_v60 = vpop.f32.mrb[8].mxu1 }
 0x66e   : > { %1794 = vmatprep.mubr.msk.f32.mxu0 %vm416_vm1, %v803_v59  ;;  %v1339_v63 = vpop.f32.mrb[9].mxu1  ;;  %v1345_v2 = vadd.f32 %v1827_v60, %v2116_v21  ;;  %v1697_v59 = vld [vmem:[%s2243_s6] ss:$0 sm:$0xff] }
 0x66f   : > { %v1340_v1 = vadd.f32 %v1339_v63, %v2121_v22  ;;  %1795 = vmatmul.mubr.msk.f32.vlgmr.msra.gmra.mrb[4].mxu0 %vm416_vm1, %v1791_v58  ;;  %v405_v22 = vld [vmem:[%s2241_s4 + $0x10] sm:$0xff]  ;;  %v1698_v63 = vld [vmem:[%s2244_s7] ss:$0 sm:$0xff] }
 0x670   : > { %1798 = vmatpush3.msra.mxu0 %v403_v52  ;;  %1799 = vmatprep.mubr.msk.f32.mxu0 %vm416_vm1, %v2152_v62  ;;  %v1351_v8 = vsel %vm502_vm3, %v1345_v2, -inf  ;;  %v1976_v9 = vpop.eup %1975  ;;  %v1884_v62 = vpack.c.bf16 %v1952_v11, %v1951_v12 }
 0x671   : > { %1875 = vmatprep.subr.bf16.mxu0 %v1874_v0  ;;  %v1348_v3 = vsel %vm502_vm3, %v1340_v1, -inf  ;;  %v1086_v21 = vmul.f32 %v1976_v9, %v1972_v49 }
 0x672   : > { %1349 = vmax.xlane.f32.xlu0 %v1348_v3 }
 0x676   : > { %1352 = vmax.xlane.f32.xlu0 %v1351_v8 }
 0x677   : > { %1800 = vmatmul.mubr.msk.f32.vlgmr.msra.gmra.mrb[4].mxu0 %vm416_vm1, %v2150_v61 }
 0x678   : > { %1877 = vmatpush3.bf16.msra.mxu0 %v1874_v0  ;;  %1813 = vmatprep.mubr.msk.f32.mxu0 %vm502_vm3, %v1085_v10 }
 0x679   : > { %1816 = vmatprep.subr.mxu0 %v405_v22 }
 0x67b   : > { %1814 = vmatmul.mubr.msk.f32.vlgmr.msra.gmra.mrb[6].mxu0 %vm502_vm3, %v1086_v21 }
 0x67c   : > { %1817 = vmatpush3.msra.mxu0 %v405_v22 }
 0x67d   : > { %1885 = vmatprep.subr.bf16.mxu0 %v1884_v62 }
 0x6ff   : > { %v1350_v15 = vpop.xlane.xlu0 %1349 }
 0x700   : > { %v1354_v16 = vsub.f32 %v1340_v1, %v1350_v15 }
 0x702   : > { %v1356_v17 = vmul.f32 1.442695, %v1354_v16 }
 0x703   : > { %v1353_v19 = vpop.xlane.xlu0 %1352 }
 0x704   : > { %1977 = vpow2.f32 %v1356_v17  ;;  %v1355_v23 = vsub.f32 %v1345_v2, %v1353_v19 }
 0x706   : > { %v1358_v24 = vmul.f32 1.442695, %v1355_v23 }
 0x708   : > { %1979 = vpow2.f32 %v1358_v24 }
 0x70e   : > { %v1978_v25 = vpop.eup %1977 }
 0x70f   : > { %v1360_v61 = vsel %vm502_vm3, %v1978_v25, 0.0 }
 0x710   : > { %1361 = vadd.xlane.f32.xlu0 %v1360_v61 }
 0x712   : > { %v1980_v26 = vpop.eup %1979 }
 0x713   : > { %v1363_v27 = vsel %vm502_vm3, %v1980_v26, 0.0 }
 0x714   : > { %1364 = vadd.xlane.f32.xlu0 %v1363_v27 }
 0x74e   : > { %v1815_v28 = vpop.f32.mrb[6].mxu0 }
 0x74f   : > { %v1165_v29 = vpop.f32.mrb[7].mxu0 }
 0x750   : > { %1818 = vmatprep.mubr.msk.f32.mxu0 %vm416_vm1, %v1165_v29 }
 0x751   : > { %1819 = vmatmul.mubr.msk.f32.vlgmr.msra.gmra.mrb[4].mxu0 %vm416_vm1, %v1815_v28 }
 0x752   : > { %1887 = vmatpush3.bf16.msra.mxu0 %v1884_v62 }
 0x753   : > { %1835 = vmatprep.subr.mxu0 %v406_v14 }
 0x79d   : > { %v1362_v20 = vpop.xlane.xlu0 %1361 }
 0x79e   : > { %1981 = vrcp.f32 %v1362_v20 }
 0x7a1   : > { %v1365_v30 = vpop.xlane.xlu0 %1364 }
 0x7a2   : > { %1983 = vrcp.f32 %v1365_v30 }
 0x7a8   : > { %v1982_v31 = vpop.eup %1981 }
 0x7a9   : > { %v1368_v32 = vmul.f32 %v1982_v31, %v1978_v25 }
 0x7ab   : > { %1832 = vmatprep.mubr.msk.f32.mxu0 %vm502_vm3, %v1368_v32 }
 0x7ac   : > { %v1984_v33 = vpop.eup %1983 }
 0x7ad   : > { %v1369_v34 = vmul.f32 %v1984_v33, %v1980_v26 }
 0x7af   : > { %1833 = vmatmul.mubr.msk.f32.vlgmr.msra.gmra.mrb[8].mxu0 %vm502_vm3, %v1369_v34 }
 0x7b0   : > { %1836 = vmatpush3.msra.mxu0 %v406_v14 }
 0x882   : > { %v1834_v35 = vpop.f32.mrb[8].mxu0 }
 0x883   : > { %v1448_v36 = vpop.f32.mrb[9].mxu0 }
 0x884   : > { %1837 = vmatprep.mubr.msk.f32.mxu0 %vm416_vm1, %v1448_v36 }
 0x885   : > { %1838 = vmatmul.mubr.msk.f32.vlgmr.msra.gmra.mrb[4].mxu0 %vm416_vm1, %v1834_v35 }
 0x958   : > { %v1839_v13 = vpop.f32.mrb[4].mxu0 }
 0x959   : > { %v1547_v38 = vadd.f32 %v1839_v13, %v1696_v37  ;;  %v1529_v39 = vpop.f32.mrb[5].mxu0 }
 0x95a   : > { %v1546_v40 = vadd.f32 %v1696_v37, %v1529_v39 }
 0x95b   : > { %v1549_v41 = vadd.f32 %v1547_v38, %v2085_v7 }
 0x95c   : > { %v1548_v42 = vadd.f32 %v1546_v40, %v2081_v6 }
 0x95d   : > { %v1555_v43 = vsel %vm319_vm0, %v1549_v41, 0.0 }
 0x95e   : > { %1556 = vadd.xlane.f32.xlu1 %v1555_v43  ;;  %v1552_v44 = vsel %vm319_vm0, %v1548_v42, 0.0 }
 0x95f   : > { %1553 = vadd.xlane.f32.xlu0 %v1552_v44 }
 0x9eb   : > { %v1557_v18 = vpop.xlane.xlu1 %1556 }
 0x9ec   : > { %v1560_v45 = vmul.f32 0.03125, %v1557_v18  ;;  %v1554_v46 = vpop.xlane.xlu0 %1553 }
 0x9ed   : > { %v1559_v47 = vmul.f32 0.03125, %v1554_v46 }
 0x9ee   : > { %v1562_v48 = vsub.f32 %v1549_v41, %v1560_v45 }
 0x9ef   : > { %v1561_v49 = vsub.f32 %v1548_v42, %v1559_v47 }
 0x9f0   : > { %v1564_v52 = vmul.f32 %v1562_v48, %v1562_v48 }
 0x9f1   : > { %v1563_v50 = vmul.f32 %v1561_v49, %v1561_v49 }
 0x9f2   : > { %v1568_v7 = vsel %vm319_vm0, %v1564_v52, 0.0 }
 0x9f3   : > { %v1565_v51 = vsel %vm319_vm0, %v1563_v50, 0.0 }
 0x9f4   : > { %1566 = vadd.xlane.f32.xlu0 %v1565_v51 }
 0x9f8   : > { %1569 = vadd.xlane.f32.xlu0 %v1568_v7 }
 0xa81   : > { %v1567_v6 = vpop.xlane.xlu0 %1566 }
 0xa82   : > { %v1571_v53 = vmul.f32 0.03125, %v1567_v6 }
 0xa84   : > { %v1573_v54 = vadd.f32 1e-05, %v1571_v53 }
 0xa85   : > { %v1570_v55 = vpop.xlane.xlu0 %1569 }
 0xa86   : > { %1985 = vrsqrt.f32 %v1573_v54  ;;  %v1572_v56 = vmul.f32 0.03125, %v1570_v55 }
 0xa88   : > { %v1574_v57 = vadd.f32 1e-05, %v1572_v56 }
 0xa8a   : > { %1987 = vrsqrt.f32 %v1574_v57 }
 0xa90   : > { %v1986_v58 = vpop.eup %1985 }
 0xa91   : > { %v1577_v60 = vmul.f32 %v1986_v58, %v1561_v49 }
 0xa93   : > { %v1585_v0 = vmul.f32 %v1697_v59, %v1577_v60 }
 0xa94   : > { %v1988_v1 = vpop.eup %1987 }
 0xa95   : > { %v1593_v2 = vadd.f32 %v1698_v63, %v1585_v0  ;;  %v1578_v3 = vmul.f32 %v1988_v1, %v1562_v48 }
 0xa97   : > { %1595 = vst.msk [vmem:[%s305_s13] sm:$0xff] %vm319_vm0, %v1593_v2  ;;  %v1586_v4 = vmul.f32 %v1697_v59, %v1578_v3 }
 0xa99   : > { %v1594_v5 = vadd.f32 %v1698_v63, %v1586_v4 }
 0xa9b   : > { %1596 = vst.msk [vmem:[%s305_s13 + $0x8] sm:$0xff] %vm319_vm0, %v1594_v5 }
 0xa9c PF: > { %s18_s27 = sadd.s32 1, %s1995_s27  }
 0xa9d   : > { %p15_p4 = scmp.ge.s32.totalorder %s18_s27, 4  }
 0xa9f   :  { %17 = sbr.rel (!%p15_p4) target bundleno = 1 (0x1), region = 82 }

// kernel: decoder_forward.7
= control target key start
LH: loop header
LB: loop body
LE: loop exit
PB: predicated region body
PF: predicated region fallthrough
CT: control target
= control target key end

     0   :  { %s2343_s17 = smov 0   ;;  %s2565_s0 = inlined_call_operand.vmem [shape: f32[2,16,32], index: 0, kind: input, shape index: {}]   ;;  %s2566_s1 = inlined_call_operand.vmem [shape: f32[2,12,32], index: 1, kind: input, shape index: {}]   ;;  %s2567_s2 = inlined_call_operand.vmem [shape: f32[2,16,12], index: 2, kind: input, shape index: {}]   ;;  %s2568_s3 = inlined_call_operand.vmem [shape: f32[32,32], index: 3, kind: input, shape index: {}]   ;;  %s2569_s4 = inlined_call_operand.vmem [shape: f32[1,32], index: 4, kind: input, shape index: {}]   ;;  %s2570_s5 = inlined_call_operand.vmem [shape: f32[32,64], index: 5, kind: input, shape index: {}]   ;;  %s2571_s6 = inlined_call_operand.vmem [shape: f32[1,64], index: 6, kind: input, shape index: {}]   ;;  %s2572_s7 = inlined_call_operand.vmem [shape: f32[32,32], index: 7, kind: input, shape index: {}]   ;;  %s2573_s8 = inlined_call_operand.vmem [shape: f32[1,32], index: 8, kind: input, shape index: {}]   ;;  %s2574_s9 = inlined_call_operand.vmem [shape: f32[1,32], index: 9, kind: input, shape index: {}]   ;;  %s2575_s10 = inlined_call_operand.vmem [shape: f32[1,32], index: 10, kind: input, shape index: {}]   ;;  %s2576_s11 = inlined_call_operand.vmem [shape: f32[2,16,32], index: 11, kind: output, shape index: {}]  }
   0x1 LB: > { %s1892_s18 = sadd.s32 4294967295, %s2273_s17   ;;  %p1896_p0 = scmp.ge.s32.totalorder %s2273_s17, 1  ;;  %s2273_s17 = sphi %s2343_s17, %s21_s17  }
   0x2   : > { %p357_p1 = scmp.lt.s32.totalorder %s2273_s17, 3 }
   0x4   : > { %p358_p2 = pnand %p1896_p0, %p357_p1 }
   0x5   : > { %v524_v0 = vld [vmem:[%s2570_s5] sm:$0xff] (!%p358_p2)  ;;  %v525_v1 = vld [vmem:[%s2570_s5 + $0x8] sm:$0xff] (!%p358_p2)  ;;  %v526_v2 = vld [vmem:[%s2570_s5 + $0x10] sm:$0xff] (!%p358_p2)  ;;  %p407_p3 = scmp.lt.s32.totalorder (!%p358_p2), %s1892_s18, 1  ;;  %vm442_vm0 = vcmask (!%p358_p2), 261120   ;;  %vm625_vm1 = vcmask (!%p358_p2), 64512  }
   0x6   : > { %361 = sbr.rel (%p358_p2) target bundleno = 2833 (0xb11), region = 64  ;;  %v2118_v3 = vpack.c.bf16 (!%p358_p2), %v525_v1, %v524_v0  ;;  %v527_v4 = vld [vmem:[%s2570_s5 + $0x18] sm:$0xff] (!%p358_p2)  ;;  %v431_v5 = vld [vmem:[%s2568_s3] sm:$0xff] (!%p358_p2)  ;;  %v432_v6 = vld [vmem:[%s2568_s3 + $0x8] sm:$0xff] (!%p358_p2)  ;;  %s2275_s28 = smov (!%p358_p2), 120   ;;  %vm713_vm3 = vcmask (!%p358_p2), 97280  }
   0x7   : > { %v2122_v7 = vpack.c.bf16 (!%p358_p2), %v527_v4, %v526_v2  ;;  %v2110_v8 = vpack.c.bf16 (!%p358_p2), %v432_v6, %v431_v5  ;;  %v433_v9 = vld [vmem:[%s2568_s3 + $0x10] sm:$0xff] (!%p358_p2)  ;;  %v434_v10 = vld [vmem:[%s2568_s3 + $0x18] sm:$0xff] (!%p358_p2)  ;;  %v1908_v16 = vld [vmem:[%s2571_s6] ss:$0 sm:$0xff] (!%p358_p2)  ;;  %s2276_s13 = smov (!%p358_p2), 96   ;;  %vm747_vm4 = vcmask (!%p358_p2), 1043456  }
   0x8   : > { %2119 = vmatprep.subr.bf16.mxu1 (!%p358_p2), %v2118_v3  ;;  %v2114_v11 = vpack.c.bf16 (!%p358_p2), %v434_v10, %v433_v9  ;;  %v1905_v18 = vld [vmem:[%s2569_s4] ss:$0 sm:$0xff] (!%p358_p2)  ;;  %vm2403_vm2 = vmpackc.low (!%p358_p2), %vm625_vm1, %vm625_vm1  ;;  %vm2277_vm5 = vmmov (!%p358_p2), 1   ;;  %s2278_s14 = smov (!%p358_p2), 112   ;;  %s2279_s15 = smov (!%p358_p2), 104  }
   0x9   : > { %2121 = vmatpush3.bf16.msra.mxu1 (!%p358_p2), %v2118_v3  ;;  %2111 = vmatprep.subr.bf16.mxu0 (!%p358_p2), %v2110_v8  ;;  %vm2438_vm6 = vmpackc.low (!%p358_p2), %vm747_vm4, %vm2277_vm5  ;;  %s2280_s19 = smov (!%p358_p2), 88  }
   0xa   : > { %2123 = vmatprep.subr.bf16.mxu1 (!%p358_p2), %v2122_v7  ;;  %2113 = vmatpush3.bf16.msra.mxu0 (!%p358_p2), %v2110_v8 }
   0xb   : > { %2115 = vmatprep.subr.bf16.mxu0 (!%p358_p2), %v2114_v11 }
   0xd   : > { %s2582_s18 = smov (!%p407_p3, %s1892_s18), 1  ;;  %2125 = vmatpush3.bf16.msra.mxu1 %v2122_v7 }
   0xe   : > { %s2375_s16 = sshll.u32 %s2582_s18, 4  ;;  %2117 = vmatpush3.bf16.msra.mxu0 %v2114_v11  ;;  %s2282_s18 = smov 72  }
   0xf   : > { %s416_s21 = scalar_lea.vmem %s2566_s1, %s2375_s16  ;;  %s411_s24 = scalar_lea.vmem %s2565_s0, %s2375_s16 }
  0x10   : > { %v429_v12 = vld [vmem:[%s416_s21] sm:$0xff]  ;;  %v430_v14 = vld [vmem:[%s416_s21 + $0x8] sm:$0xf]  ;;  %s421_s12 = scalar_lea.vmem %s2567_s2, %s2375_s16  ;;  %s426_s21 = scalar_lea.vmem %s2576_s11, %s2375_s16 }
  0x11   : > { %2031 = vmatprep.mubr.msk.f32.mxu1 %vm442_vm0, %v429_v12  ;;  %v2386_v13 = vld [vmem:[%s411_s24] sm:$0xff]  ;;  %v2390_v15 = vld [vmem:[%s411_s24 + $0x8] sm:$0xff]  ;;  %s2281_s24 = smov 80  }
  0x12   : > { %2020 = vmatprep.mubr.msk.f32.mxu0 %vm442_vm0, %v2386_v13  ;;  %2032 = vmatmul.mubr.msk.f32.vlgmr.msra.gmra.mrb[0].mxu1 %vm442_vm0, %v430_v14  ;;  %v2429_v31 = vld [vmem:[%s421_s12] sm:$0xff]  ;;  %v2431_v33 = vld [vmem:[%s421_s12 + $0x8] sm:$0xff] }
  0x13   : > { %2021 = vmatmul.mubr.msk.f32.vlgmr.msra.gmra.mrb[0].mxu0 %vm442_vm0, %v2390_v15 }
  0xe5   : > { %v2033_v17 = vpop.f32.mrb[0].mxu1 }
  0xe6   : > { %v613_v19 = vadd.f32 %v2033_v17, %v1908_v16  ;;  %v607_v20 = vpop.f32.mrb[1].mxu1  ;;  %v2022_v21 = vpop.f32.mrb[0].mxu0 }
  0xe7   : > { %v608_v22 = vadd.f32 %v1908_v16, %v607_v20  ;;  %v515_v23 = vpop.f32.mrb[1].mxu0  ;;  %v521_v29 = vadd.f32 %v2022_v21, %v1905_v18 }
  0xe8   : > { %v516_v25 = vadd.f32 %v1905_v18, %v515_v23 }
  0xe9   : > { %v2407_v26 = vpack.i.bf16 %v613_v19, %v608_v22  ;;  %v2126_v27 = vpack.c.bf16 %v613_v19, %v608_v22  ;;  %v2421_v30 = vmul.f32 0.35355338, %v521_v29 }
  0xea   : > { %v2409_v28 = vmul.f32 0.35355338, %v516_v25 }
  0xeb   : > { %2202 = vrot.lane.b32.xlu1 %v2407_v26, %s2275_s28  ;;  %2128 = vmatprep.subr.msk.bf16.mxu0 %vm2403_vm2, %v2126_v27 }
  0xec   : > { %2131 = vmatpush3.bf16.xpose.msk.msra.mxu0 %vm2403_vm2, %v2126_v27  ;;  %2038 = vmatprep.mubr.msk.f32.mxu0 %vm625_vm1, %v2409_v28 }
  0xef   : > { %825 = vrot.lane.b32.xlu1 %v2409_v28, %s2275_s28 }
  0xf3   : > { %2039 = vmatmul.mubr.msk.f32.vlgmr.msra.gmra.mrb[2].mxu0 %vm625_vm1, %v2421_v30 }
 0x15d   : > { %v2203_v42 = vpop.permute.xlu1 %2202 }
 0x15e   : > { %v2205_v46 = vunpack.i.h.bf16 %v2203_v42  ;;  %v2204_v48 = vunpack.i.l.bf16 %v2203_v42 }
 0x160   : > { %v2138_v53 = vpack.c.bf16 %v2205_v46, %v2204_v48  ;;  %v619_v48 = vld [vmem:[%s2572_s7 + $0x8] sm:$0xff] }
 0x161   : > { %v826_v58 = vpop.permute.xlu1 %825  ;;  %2062 = vmatprep.subr.mxu0 %v619_v48 }
 0x162   : > { %2063 = vmatpush3.msra.mxu0 %v619_v48 }
 0x1c6   : > { %v2040_v32 = vpop.f32.mrb[2].mxu0 }
 0x1c7   : > { %v704_v34 = vpop.f32.mrb[3].mxu0  ;;  %v710_v36 = vadd.f32 %v2040_v32, %v2431_v33 }
 0x1c8   : > { %v705_v35 = vadd.f32 %v704_v34, %v2429_v31 }
 0x1c9   : > { %v717_v38 = vsel %vm713_vm3, %v710_v36, -inf }
 0x1ca   : > { %v714_v37 = vsel %vm713_vm3, %v705_v35, -inf }
 0x1cb   : > { %715 = vmax.xlane.f32.xlu0 %v714_v37 }
 0x1cf   : > { %718 = vmax.xlane.f32.xlu0 %v717_v38 }
 0x1e5   : > { %2197 = vrot.lane.b32.xlu0 %v2407_v26, %s2276_s13 }
 0x258   : > { %v716_v39 = vpop.xlane.xlu0 %715 }
 0x259   : > { %v720_v40 = vsub.f32 %v705_v35, %v716_v39 }
 0x25b   : > { %v722_v44 = vmul.f32 1.442695, %v720_v40 }
 0x25c   : > { %v719_v41 = vpop.xlane.xlu0 %718 }
 0x25d   : > { %v721_v43 = vsub.f32 %v710_v36, %v719_v41 }
 0x25f   : > { %v724_v45 = vmul.f32 1.442695, %v721_v43 }
 0x260   : > { %v2198_v47 = vpop.permute.xlu0 %2197 }
 0x261   : > { %2231 = vpow2.f32 %v724_v45  ;;  %v2200_v49 = vunpack.i.h.bf16 %v2198_v47  ;;  %v2199_v50 = vunpack.i.l.bf16 %v2198_v47 }
 0x262   : > { %2233 = vpow2.f32 %v722_v44 }
 0x263   : > { %v2132_v52 = vpack.c.bf16 %v2200_v49, %v2199_v50  ;;  %v618_v49 = vld [vmem:[%s2572_s7] sm:$0xff] }
 0x264   : > { %2067 = vmatprep.subr.mxu0 %v618_v49 }
 0x265   : > { %2134 = vmatprep.subr.msk.bf16.mxu1 %vm2438_vm6, %v2132_v52 }
 0x266   : > { %2137 = vmatpush3.bf16.msk.msra.mxu1 %vm2438_vm6, %v2132_v52 }
 0x267   : > { %2140 = vmatprep.subr.msk.bf16.mxu1 %vm2403_vm2, %v2138_v53 }
 0x26b   : > { %v2232_v54 = vpop.eup %2231 }
 0x26c   : > { %v729_v55 = vsel %vm713_vm3, %v2232_v54, 0.0  ;;  %v2234_v56 = vpop.eup %2233 }
 0x26d   : > { %730 = vadd.xlane.f32.xlu1 %v729_v55  ;;  %v726_v57 = vsel %vm713_vm3, %v2234_v56, 0.0 }
 0x271   : > { %727 = vadd.xlane.f32.xlu1 %v726_v57 }
 0x282   : > { %827 = vrot.lane.b32.xlu1 %v2421_v30, %s2275_s28 }
 0x2fa   : > { %v731_v59 = vpop.xlane.xlu1 %730 }
 0x2fb   : > { %2235 = vrcp.f32 %v731_v59 }
 0x2fe   : > { %v728_v60 = vpop.xlane.xlu1 %727 }
 0x2ff   : > { %2237 = vrcp.f32 %v728_v60 }
 0x302   : > { %v828_v1 = vpop.permute.xlu1 %827 }
 0x305   : > { %v2236_v61 = vpop.eup %2235 }
 0x306   : > { %v735_v0 = vmul.f32 %v2236_v61, %v2232_v54 }
 0x309   : > { %v2238_v62 = vpop.eup %2237 }
 0x30a   : > { %v734_v63 = vmul.f32 %v2238_v62, %v2234_v56 }
 0x30c   : > { %2045 = vmatprep.mubr.msk.f32.mxu1 %vm713_vm3, %v734_v63 }
 0x30d   : > { %2046 = vmatmul.mubr.msk.f32.vlgmr.msra.gmra.mrb[2].mxu1 %vm713_vm3, %v735_v0 }
 0x30e   : > { %2143 = vmatpush3.bf16.xpose.msk.msra.mxu1 %vm2403_vm2, %v2138_v53  ;;  %2052 = vmatprep.mubr.msk.f32.mxu1 %vm625_vm1, %v826_v58 }
 0x315   : > { %2053 = vmatmul.mubr.msk.f32.vlgmr.msra.gmra.mrb[4].mxu1 %vm625_vm1, %v828_v1 }
 0x3e0   : > { %v2458_v2 = vpop.f32.mrb[2].mxu1 }
 0x3e1   : > { %v2460_v3 = vpop.f32.mrb[3].mxu1 }
 0x3e8   : > { %v2054_v4 = vpop.f32.mrb[4].mxu1 }
 0x3e9   : > { %v913_v5 = vadd.f32 %v2054_v4, %v2431_v33  ;;  %v907_v6 = vpop.f32.mrb[5].mxu1 }
 0x3ea   : > { %v908_v7 = vadd.f32 %v907_v6, %v2429_v31 }
 0x3eb   : > { %v919_v8 = vsel %vm713_vm3, %v913_v5, -inf }
 0x3ec   : > { %920 = vmax.xlane.f32.xlu1 %v919_v8  ;;  %v916_v9 = vsel %vm713_vm3, %v908_v7, -inf }
 0x3ed   : > { %917 = vmax.xlane.f32.xlu0 %v916_v9 }
 0x3fd   : > { %2212 = vrot.lane.b32.xlu1 %v2407_v26, %s2278_s14 }
 0x401   : > { %1188 = vrot.lane.b32.xlu1 %v2409_v28, %s2278_s14 }
 0x405   : > { %1190 = vrot.lane.b32.xlu1 %v2421_v30, %s2278_s14 }
 0x409   : > { %1472 = vrot.lane.b32.xlu1 %v2409_v28, %s2279_s15 }
 0x479   : > { %v921_v10 = vpop.xlane.xlu1 %920 }
 0x47a   : > { %v923_v11 = vsub.f32 %v913_v5, %v921_v10  ;;  %v918_v12 = vpop.xlane.xlu0 %917 }
 0x47b   : > { %v922_v14 = vsub.f32 %v908_v7, %v918_v12 }
 0x47c   : > { %v926_v16 = vmul.f32 1.442695, %v923_v11 }
 0x47d   : > { %v924_v17 = vmul.f32 1.442695, %v922_v14  ;;  %v2213_v25 = vpop.permute.xlu1 %2212  ;;  %v620_v14 = vld [vmem:[%s2572_s7 + $0x10] sm:$0xff] }
 0x47e   : > { %2239 = vpow2.f32 %v926_v16  ;;  %v2215_v28 = vunpack.i.h.bf16 %v2213_v25  ;;  %v2214_v29 = vunpack.i.l.bf16 %v2213_v25 }
 0x47f   : > { %2241 = vpow2.f32 %v924_v17 }
 0x480   : > { %v2150_v36 = vpack.c.bf16 %v2215_v28, %v2214_v29 }
 0x481   : > { %v1189_v41 = vpop.permute.xlu1 %1188 }
 0x485   : > { %v1191_v45 = vpop.permute.xlu1 %1190 }
 0x488   : > { %v2240_v18 = vpop.eup %2239 }
 0x489   : > { %v931_v19 = vsel %vm713_vm3, %v2240_v18, 0.0  ;;  %v2242_v20 = vpop.eup %2241  ;;  %v1473_v46 = vpop.permute.xlu1 %1472 }
 0x48a   : > { %932 = vadd.xlane.f32.xlu0 %v931_v19  ;;  %v928_v21 = vsel %vm713_vm3, %v2242_v20, 0.0 }
 0x48e   : > { %929 = vadd.xlane.f32.xlu0 %v928_v21 }
 0x4a4   : > { %2207 = vrot.lane.b32.xlu0 %v2407_v26, %s2280_s19 }
 0x4a8   : > { %2217 = vrot.lane.b32.xlu0 %v2407_v26, %s2279_s15 }
 0x4ac   : > { %1474 = vrot.lane.b32.xlu0 %v2421_v30, %s2279_s15 }
 0x517   : > { %v933_v22 = vpop.xlane.xlu0 %932 }
 0x518   : > { %2243 = vrcp.f32 %v933_v22 }
 0x51b   : > { %v930_v23 = vpop.xlane.xlu0 %929 }
 0x51c   : > { %2245 = vrcp.f32 %v930_v23 }
 0x51f   : > { %v2208_v27 = vpop.permute.xlu0 %2207 }
 0x520   : > { %v2210_v32 = vunpack.i.h.bf16 %v2208_v27  ;;  %v2209_v34 = vunpack.i.l.bf16 %v2208_v27 }
 0x522   : > { %v2144_v35 = vpack.c.bf16 %v2210_v32, %v2209_v34  ;;  %v2244_v37 = vpop.eup %2243 }
 0x523   : > { %v2218_v38 = vpop.permute.xlu0 %2217  ;;  %v937_v40 = vmul.f32 %v2244_v37, %v2240_v18 }
 0x524   : > { %2146 = vmatprep.subr.msk.bf16.mxu1 %vm2438_vm6, %v2144_v35  ;;  %v2220_v42 = vunpack.i.h.bf16 %v2218_v38  ;;  %v2219_v43 = vunpack.i.l.bf16 %v2218_v38 }
 0x525   : > { %2149 = vmatpush3.bf16.msk.msra.mxu1 %vm2438_vm6, %v2144_v35 }
 0x526   : > { %v2246_v30 = vpop.eup %2245  ;;  %2152 = vmatprep.subr.msk.bf16.mxu1 %vm2403_vm2, %v2150_v36  ;;  %v2162_v44 = vpack.c.bf16 %v2220_v42, %v2219_v43 }
 0x527   : > { %v936_v39 = vmul.f32 %v2246_v30, %v2242_v20  ;;  %v1475_v47 = vpop.permute.xlu0 %1474 }
 0x529   : > { %2059 = vmatprep.mubr.msk.f32.mxu1 %vm713_vm3, %v936_v39 }
 0x52a   : > { %2060 = vmatmul.mubr.msk.f32.vlgmr.msra.gmra.mrb[6].mxu1 %vm713_vm3, %v937_v40 }
 0x52b   : > { %2076 = vmatprep.mubr.msk.f32.mxu1 %vm625_vm1, %v1189_v41 }
 0x52e   : > { %2155 = vmatpush3.bf16.xpose.msk.msra.mxu1 %vm2403_vm2, %v2150_v36 }
 0x52f   : > { %2164 = vmatprep.subr.msk.bf16.mxu1 %vm2403_vm2, %v2162_v44 }
 0x535   : > { %2077 = vmatmul.mubr.msk.f32.vlgmr.msra.gmra.mrb[8].mxu1 %vm625_vm1, %v1191_v45  ;;  %v621_v45 = vld [vmem:[%s2572_s7 + $0x18] sm:$0xff] }
 0x536   : > { %2167 = vmatpush3.bf16.xpose.msk.msra.mxu1 %vm2403_vm2, %v2162_v44  ;;  %2095 = vmatprep.mubr.msk.f32.mxu1 %vm625_vm1, %v1473_v46 }
 0x53d   : > { %2096 = vmatmul.mubr.msk.f32.vlgmr.msra.gmra.mrb[10].mxu1 %vm625_vm1, %v1475_v47 }
 0x5fd   : > { %v2061_v50 = vpop.f32.mrb[6].mxu1 }
 0x5fe   : > { %v1017_v52 = vpop.f32.mrb[7].mxu1 }
 0x5ff   : > { %2064 = vmatprep.mubr.msk.f32.mxu0 %vm625_vm1, %v1017_v52 }
 0x600   : > { %2065 = vmatmul.mubr.msk.f32.vlgmr.msra.gmra.mrb[4].mxu0 %vm625_vm1, %v2061_v50 }
 0x601   : > { %2069 = vmatprep.mubr.msk.f32.mxu0 %vm625_vm1, %v2460_v3  ;;  %2068 = vmatpush3.msra.mxu0 %v618_v49  ;;  %v1947_v49 = vld [vmem:[%s2573_s8] ss:$0 sm:$0xff] }
 0x608   : > { %2070 = vmatmul.mubr.msk.f32.vlgmr.msra.gmra.mrb[4].mxu0 %vm625_vm1, %v2458_v2  ;;  %v2078_v24 = vpop.f32.mrb[8].mxu1 }
 0x609   : > { %v1276_v53 = vadd.f32 %v2078_v24, %v2431_v33  ;;  %v1270_v54 = vpop.f32.mrb[9].mxu1 }
 0x60a   : > { %v1271_v55 = vadd.f32 %v1270_v54, %v2429_v31 }
 0x60b   : > { %v1282_v56 = vsel %vm713_vm3, %v1276_v53, -inf }
 0x60c   : > { %1283 = vmax.xlane.f32.xlu0 %v1282_v56  ;;  %v1279_v57 = vsel %vm713_vm3, %v1271_v55, -inf }
 0x60d   : > { %1280 = vmax.xlane.f32.xlu1 %v1279_v57 }
 0x610   : > { %v2097_v58 = vpop.f32.mrb[10].mxu1 }
 0x611   : > { %v1554_v59 = vpop.f32.mrb[11].mxu1  ;;  %v1560_v10 = vadd.f32 %v2097_v58, %v2431_v33 }
 0x612   : > { %v1555_v8 = vadd.f32 %v1554_v59, %v2429_v31 }
 0x613   : > { %v1566_v12 = vsel %vm713_vm3, %v1560_v10, -inf }
 0x614   : > { %v1563_v11 = vsel %vm713_vm3, %v1555_v8, -inf }
 0x61e   : > { %2222 = vrot.lane.b32.xlu1 %v2407_v26, %s2281_s24 }
 0x622   : > { %2227 = vrot.lane.b32.xlu1 %v2407_v26, %s2282_s18 }
 0x699   : > { %v1284_v60 = vpop.xlane.xlu0 %1283 }
 0x69a   : > { %v1286_v61 = vsub.f32 %v1276_v53, %v1284_v60  ;;  %v1281_v62 = vpop.xlane.xlu1 %1280 }
 0x69b   : > { %v1285_v63 = vsub.f32 %v1271_v55, %v1281_v62 }
 0x69c   : > { %v1289_v0 = vmul.f32 1.442695, %v1286_v61 }
 0x69d   : > { %v1287_v1 = vmul.f32 1.442695, %v1285_v63 }
 0x69e   : > { %v2223_v2 = vpop.permute.xlu1 %2222 }
 0x69f   : > { %2247 = vpow2.f32 %v1287_v1  ;;  %v2225_v3 = vunpack.i.h.bf16 %v2223_v2  ;;  %v2224_v4 = vunpack.i.l.bf16 %v2223_v2 }
 0x6a0   : > { %2249 = vpow2.f32 %v1289_v0 }
 0x6a1   : > { %v2156_v5 = vpack.c.bf16 %v2225_v3, %v2224_v4 }
 0x6a2   : > { %v2228_v20 = vpop.permute.xlu1 %2227 }
 0x6a3   : > { %2158 = vmatprep.subr.msk.bf16.mxu0 %vm2438_vm6, %v2156_v5  ;;  %v2230_v25 = vunpack.i.h.bf16 %v2228_v20  ;;  %v2229_v27 = vunpack.i.l.bf16 %v2228_v20 }
 0x6a4   : > { %2161 = vmatpush3.bf16.msk.msra.mxu0 %vm2438_vm6, %v2156_v5 }
 0x6a5   : > { %2086 = vmatprep.subr.mxu0 %v620_v14  ;;  %v2168_v34 = vpack.c.bf16 %v2230_v25, %v2229_v27 }
 0x6a9   : > { %v2248_v6 = vpop.eup %2247 }
 0x6aa   : > { %v1291_v26 = vsel %vm713_vm3, %v2248_v6, 0.0  ;;  %v2250_v7 = vpop.eup %2249 }
 0x6ab   : > { %1292 = vadd.xlane.f32.xlu0 %v1291_v26  ;;  %v1294_v9 = vsel %vm713_vm3, %v2250_v7, 0.0 }
 0x6af   : > { %1295 = vadd.xlane.f32.xlu0 %v1294_v9  ;;  %v1949_v9 = vld [vmem:[%s2575_s10] ss:$0 sm:$0xff] }
 0x6b3   : > { %1564 = vmax.xlane.f32.xlu0 %v1563_v11 }
 0x6b7   : > { %1567 = vmax.xlane.f32.xlu0 %v1566_v12 }
 0x738   : > { %v1293_v16 = vpop.xlane.xlu0 %1292 }
 0x739   : > { %2251 = vrcp.f32 %v1293_v16 }
 0x73c   : > { %v1296_v17 = vpop.xlane.xlu0 %1295 }
 0x73d   : > { %2253 = vrcp.f32 %v1296_v17 }
 0x740   : > { %v1565_v31 = vpop.xlane.xlu0 %1564 }
 0x741   : > { %v1569_v18 = vsub.f32 %v1555_v8, %v1565_v31 }
 0x743   : > { %v2252_v19 = vpop.eup %2251  ;;  %v1571_v33 = vmul.f32 1.442695, %v1569_v18 }
 0x744   : > { %v1568_v21 = vpop.xlane.xlu0 %1567  ;;  %v1299_v22 = vmul.f32 %v2252_v19, %v2248_v6 }
 0x745   : > { %2255 = vpow2.f32 %v1571_v33  ;;  %v1570_v23 = vsub.f32 %v1560_v10, %v1568_v21 }
 0x746   : > { %2083 = vmatprep.mubr.msk.f32.mxu0 %vm713_vm3, %v1299_v22 }
 0x747   : > { %v2254_v28 = vpop.eup %2253  ;;  %v1573_v29 = vmul.f32 1.442695, %v1570_v23 }
 0x748   : > { %v1300_v32 = vmul.f32 %v2254_v28, %v2250_v7  ;;  %v1948_v7 = vld [vmem:[%s2574_s9] ss:$0 sm:$0xff] }
 0x749   : > { %2257 = vpow2.f32 %v1573_v29 }
 0x74a   : > { %2084 = vmatmul.mubr.msk.f32.vlgmr.msra.gmra.mrb[6].mxu0 %vm713_vm3, %v1300_v32 }
 0x74b   : > { %2087 = vmatpush3.msra.mxu0 %v620_v14 }
 0x74c   : > { %2170 = vmatprep.subr.msk.bf16.mxu0 %vm2438_vm6, %v2168_v34 }
 0x74f   : > { %v2256_v35 = vpop.eup %2255 }
 0x750   : > { %v1575_v36 = vsel %vm713_vm3, %v2256_v35, 0.0 }
 0x751   : > { %1576 = vadd.xlane.f32.xlu0 %v1575_v36 }
 0x753   : > { %v2258_v37 = vpop.eup %2257 }
 0x754   : > { %v1578_v30 = vsel %vm713_vm3, %v2258_v37, 0.0 }
 0x755   : > { %1579 = vadd.xlane.f32.xlu0 %v1578_v30 }
 0x7de   : > { %v1577_v38 = vpop.xlane.xlu0 %1576 }
 0x7df   : > { %2259 = vrcp.f32 %v1577_v38 }
 0x7e2   : > { %v1580_v39 = vpop.xlane.xlu0 %1579 }
 0x7e3   : > { %2261 = vrcp.f32 %v1580_v39 }
 0x7e9   : > { %v2260_v40 = vpop.eup %2259 }
 0x7ea   : > { %v1583_v44 = vmul.f32 %v2260_v40, %v2256_v35 }
 0x7ed   : > { %v2262_v43 = vpop.eup %2261 }
 0x7ee   : > { %v1584_v46 = vmul.f32 %v2262_v43, %v2258_v37 }
 0x81d   : > { %v2085_v41 = vpop.f32.mrb[6].mxu0 }
 0x81e   : > { %v1380_v42 = vpop.f32.mrb[7].mxu0 }
 0x81f   : > { %2088 = vmatprep.mubr.msk.f32.mxu0 %vm625_vm1, %v1380_v42 }
 0x820   : > { %2089 = vmatmul.mubr.msk.f32.vlgmr.msra.gmra.mrb[4].mxu0 %vm625_vm1, %v2085_v41 }
 0x821   : > { %2173 = vmatpush3.bf16.msk.msra.mxu0 %vm2438_vm6, %v2168_v34  ;;  %2102 = vmatprep.mubr.msk.f32.mxu0 %vm713_vm3, %v1583_v44 }
 0x822   : > { %2105 = vmatprep.subr.mxu0 %v621_v45 }
 0x824   : > { %2103 = vmatmul.mubr.msk.f32.vlgmr.msra.gmra.mrb[8].mxu0 %vm713_vm3, %v1584_v46 }
 0x825   : > { %2106 = vmatpush3.msra.mxu0 %v621_v45 }
 0x8f7   : > { %v2104_v47 = vpop.f32.mrb[8].mxu0 }
 0x8f8   : > { %v1664_v48 = vpop.f32.mrb[9].mxu0 }
 0x8f9   : > { %2107 = vmatprep.mubr.msk.f32.mxu0 %vm625_vm1, %v1664_v48 }
 0x8fa   : > { %2108 = vmatmul.mubr.msk.f32.vlgmr.msra.gmra.mrb[4].mxu0 %vm625_vm1, %v2104_v47 }
 0x9cd   : > { %v2109_v50 = vpop.f32.mrb[4].mxu0 }
 0x9ce   : > { %v1763_v51 = vadd.f32 %v2109_v50, %v1947_v49  ;;  %v1745_v52 = vpop.f32.mrb[5].mxu0 }
 0x9cf   : > { %v1762_v24 = vadd.f32 %v1947_v49, %v1745_v52 }
 0x9d0   : > { %v1765_v53 = vadd.f32 %v1763_v51, %v2390_v15 }
 0x9d1   : > { %v1764_v54 = vadd.f32 %v1762_v24, %v2386_v13 }
 0x9d2   : > { %v1771_v55 = vsel %vm442_vm0, %v1765_v53, 0.0 }
 0x9d3   : > { %1772 = vadd.xlane.f32.xlu1 %v1771_v55  ;;  %v1768_v56 = vsel %vm442_vm0, %v1764_v54, 0.0 }
 0x9d4   : > { %1769 = vadd.xlane.f32.xlu0 %v1768_v56 }
 0xa60   : > { %v1773_v57 = vpop.xlane.xlu1 %1772 }
 0xa61   : > { %v1776_v58 = vmul.f32 0.03125, %v1773_v57  ;;  %v1770_v59 = vpop.xlane.xlu0 %1769 }
 0xa62   : > { %v1775_v60 = vmul.f32 0.03125, %v1770_v59 }
 0xa63   : > { %v1778_v61 = vsub.f32 %v1765_v53, %v1776_v58 }
 0xa64   : > { %v1777_v62 = vsub.f32 %v1764_v54, %v1775_v60 }
 0xa65   : > { %v1780_v1 = vmul.f32 %v1778_v61, %v1778_v61 }
 0xa66   : > { %v1779_v63 = vmul.f32 %v1777_v62, %v1777_v62 }
 0xa67   : > { %v1784_v15 = vsel %vm442_vm0, %v1780_v1, 0.0 }
 0xa68   : > { %v1781_v0 = vsel %vm442_vm0, %v1779_v63, 0.0 }
 0xa69   : > { %1782 = vadd.xlane.f32.xlu0 %v1781_v0 }
 0xa6d   : > { %1785 = vadd.xlane.f32.xlu0 %v1784_v15 }
 0xaf6   : > { %v1783_v13 = vpop.xlane.xlu0 %1782 }
 0xaf7   : > { %v1787_v2 = vmul.f32 0.03125, %v1783_v13 }
 0xaf9   : > { %v1789_v3 = vadd.f32 1e-05, %v1787_v2 }
 0xafa   : > { %v1786_v4 = vpop.xlane.xlu0 %1785 }
 0xafb   : > { %2263 = vrsqrt.f32 %v1789_v3  ;;  %v1788_v5 = vmul.f32 0.03125, %v1786_v4 }
 0xafd   : > { %v1790_v6 = vadd.f32 1e-05, %v1788_v5 }
 0xaff   : > { %2265 = vrsqrt.f32 %v1790_v6 }
 0xb05   : > { %v2264_v26 = vpop.eup %2263 }
 0xb06   : > { %v1793_v8 = vmul.f32 %v2264_v26, %v1777_v62 }
 0xb08   : > { %v1801_v10 = vmul.f32 %v1948_v7, %v1793_v8 }
 0xb09   : > { %v2266_v11 = vpop.eup %2265 }
 0xb0a   : > { %v1809_v12 = vadd.f32 %v1949_v9, %v1801_v10  ;;  %v1794_v14 = vmul.f32 %v2266_v11, %v1778_v61 }
 0xb0c   : > { %1811 = vst.msk [vmem:[%s426_s21] sm:$0xff] %vm442_vm0, %v1809_v12  ;;  %v1802_v16 = vmul.f32 %v1948_v7, %v1794_v14 }
 0xb0e   : > { %v1810_v17 = vadd.f32 %v1949_v9, %v1802_v16 }
 0xb10   : > { %1812 = vst.msk [vmem:[%s426_s21 + $0x8] sm:$0xff] %vm442_vm0, %v1810_v17 }
 0xb11 PF: > { %s21_s17 = sadd.s32 1, %s2273_s17  }
 0xb12   : > { %p18_p4 = scmp.ge.s32.totalorder %s21_s17, 4  }
 0xb14   :  { %20 = sbr.rel (!%p18_p4) target bundleno = 1 (0x1), region = 100 }

</bundles_post_ra>
